<compile_context>
chip_gen: v7x
topology: tpu7x:2x2x1
jax: 0.10.0
libtpu: 0.0.40
codegen_flags: <defaults>
</compile_context>

<pallas_src>
from functools import partial

import jax
import jax.numpy as jnp
import numpy as np
from jax.experimental import pallas as pl
from jax.experimental.pallas import tpu as pltpu


def _round_up(x, m):
    return (x + m - 1) // m * m


def _pick_tile_m(n):
    for t in (512, 256, 128):
        if n % t == 0:
            return t
    return n  # small / odd N: single row tile (full-dim block is always legal)


# ----------------------------------------------------------------------------
# Fused kernel: grid = (layer_step, row_tile); layer_step outer / row_tile inner.
# ----------------------------------------------------------------------------
def _jknet_kernel(a_ref, dinv_ref, x_ref, *refs, num_layers, tile_m):
    """refs layout (after a_ref, dinv_ref, x_ref):
         refs[0:L]        per-layer weights W_l        (f_in_pad, hid_pad)
         refs[L:2L]       per-layer biases  b_l        (1, hid_pad) f32
         refs[2L:3L]      JK-head weight blocks W_out_l (hid_pad, out_pad)
         refs[3L]         head bias b_out              (1, out_pad) f32
         refs[3L+1]       output block                 (tile_m, out_pad) f32
         refs[3L+2,3L+3]  h double-buffer slots        (N, hid_pad) VMEM scratch
         refs[3L+4]       JK-head accumulator          (N, out_pad) f32 scratch
    """
    L = num_layers
    w_refs = refs[:L]
    b_refs = refs[L:2 * L]
    wout_refs = refs[2 * L:3 * L]
    bout_ref = refs[3 * L]
    o_ref = refs[3 * L + 1]
    h_slots = (refs[3 * L + 2], refs[3 * L + 3])
    acc_ref = refs[3 * L + 4]

    step = pl.program_id(0)                                  # layer-step (outer)
    row0 = pl.multiple_of(pl.program_id(1) * tile_m, tile_m)  # row-tile offset
    rows = pl.ds(row0, tile_m)

    a_blk = a_ref[...]            # (tile_m, N) raw 0/1 adjacency rows (MXU dtype)
    dinv = dinv_ref[...]          # (tile_m, 1) f32  = 1 / in_degree
    cdt = a_ref.dtype             # compute dtype fed to the MXU (f32 or bf16)

    def aggregate(src):
        # dinv * (A_rows @ src): f32 accumulation on the MXU, f32 scale on the VPU.
        return jnp.dot(a_blk, src, preferred_element_type=jnp.float32) * dinv

    # ---- step 0: h_1 = relu(dinv*(A @ X) @ W_1 + b_1); no JK-head term. ----
    @pl.when(step == 0)
    def _():
        s = aggregate(x_ref[...]).astype(cdt)
        z = jnp.dot(s, w_refs[0][...], preferred_element_type=jnp.float32)
        z = z + b_refs[0][...]
        h_slots[0][rows, :] = jnp.maximum(z, 0.0).astype(cdt)

    # ---- steps 1..L-1: s_l = dinv*(A @ h_l) is SHARED by layer l+1 and the
    #      JK-head term of h_l (this is the aggregation-reuse rewrite). ----
    for l in range(1, L):
        @pl.when(step == l)
        def _(l=l):
            s = aggregate(h_slots[(l - 1) % 2][...]).astype(cdt)
            head = jnp.dot(s, wout_refs[l - 1][...],
                           preferred_element_type=jnp.float32)
            if l == 1:
                acc_ref[rows, :] = head                       # init accumulator
            else:
                acc_ref[rows, :] = acc_ref[rows, :] + head
            z = jnp.dot(s, w_refs[l][...], preferred_element_type=jnp.float32)
            z = z + b_refs[l][...]
            h_slots[l % 2][rows, :] = jnp.maximum(z, 0.0).astype(cdt)

    # ---- step L: last aggregation feeds only the head; lane-dense f32 store. ----
    @pl.when(step == L)
    def _():
        s = aggregate(h_slots[(L - 1) % 2][...]).astype(cdt)
        head = jnp.dot(s, wout_refs[L - 1][...], preferred_element_type=jnp.float32)
        if L == 1:
            out = head + bout_ref[...]
        else:
            out = acc_ref[rows, :] + head + bout_ref[...]
        o_ref[...] = out.astype(o_ref.dtype)


# ----------------------------------------------------------------------------
# JAX wrappers
# ----------------------------------------------------------------------------
def init_jknet_params(key, in_dim, hid_dim, out_dim, num_layers):
    """Glorot-uniform weights, zero biases (matches reset_parameters)."""
    params = {"layers": []}
    dims_in = [in_dim] + [hid_dim] * (num_layers - 1)
    for d_in in dims_in:
        key, sub = jax.random.split(key)
        limit = float(np.sqrt(6.0 / (d_in + hid_dim)))
        W = jax.random.uniform(sub, (d_in, hid_dim), jnp.float32, -limit, limit)
        params["layers"].append((W, jnp.zeros((1, hid_dim), jnp.float32)))
    cat_dim = hid_dim * num_layers
    key, sub = jax.random.split(key)
    limit = float(np.sqrt(6.0 / (cat_dim + out_dim)))
    params["out"] = (
        jax.random.uniform(sub, (cat_dim, out_dim), jnp.float32, -limit, limit),
        jnp.zeros((1, out_dim), jnp.float32),
    )
    return params


def jknet_forward(A, feats, params, *, tile_m=None, compute_dtype=jnp.float32):
    N = A.shape[0]
    A = A.astype(jnp.float32)
    # norm='right': 1/in_degree, clamped to >= 1 (DGL clamps zero in-degree).
    deg = jnp.sum(A, axis=1, keepdims=True)
    dinv = (1.0 / jnp.clip(deg, 1.0, None)).astype(jnp.float32)

    layers = params["layers"]
    L = len(layers)
    in_dim = feats.shape[1]
    hid = layers[0][0].shape[1]
    W_out, b_out = params["out"]
    out_dim = W_out.shape[1]

    hid_pad = _round_up(hid, 128)
    out_pad = _round_up(out_dim, 128)
    if tile_m is None:
        tile_m = _pick_tile_m(N)
    assert N % tile_m == 0, "tile_m must divide N"
    n_tiles = N // tile_m

    cdt = jnp.dtype(compute_dtype)
    isz = cdt.itemsize

    # Zero-pad parameters to 128-lane widths (padded rows/cols are exact zeros,
    # results unchanged); MXU operands cast to the compute dtype, biases stay f32.
    Ws, Bs, Wouts = [], [], []
    for li, (W, b) in enumerate(layers):
        f_in = W.shape[0]
        f_in_pad = f_in if li == 0 else hid_pad
        Ws.append(jnp.zeros((f_in_pad, hid_pad), cdt).at[:f_in, :hid].set(W.astype(cdt)))
        Bs.append(jnp.zeros((1, hid_pad), jnp.float32)
                  .at[:, :hid].set(jnp.reshape(b, (1, hid)).astype(jnp.float32)))
    for li in range(L):
        blk = W_out[li * hid:(li + 1) * hid, :]
        Wouts.append(jnp.zeros((hid_pad, out_pad), cdt)
                     .at[:hid, :out_dim].set(blk.astype(cdt)))
    Bout = jnp.zeros((1, out_pad), jnp.float32) \
              .at[:, :out_dim].set(jnp.reshape(b_out, (1, out_dim)).astype(jnp.float32))

    A_c = A.astype(cdt)        # raw 0/1 adjacency: exact even in bf16
    X_c = feats.astype(cdt)

    in_arrays = [A_c, dinv, X_c] + Ws + Bs + Wouts + [Bout]

    def _resident(arr):
        # Full-array block, constant index -> fetched once, VMEM-resident.
        return pl.BlockSpec(arr.shape, lambda l, i: (0, 0))

    in_specs = ([pl.BlockSpec((tile_m, N), lambda l, i: (i, 0)),   # A row tile (pipelined)
                 pl.BlockSpec((tile_m, 1), lambda l, i: (i, 0)),   # 1/deg rows
                 _resident(X_c)]
                + [_resident(a) for a in Ws + Bs + Wouts]
                + [_resident(Bout)])
    out_spec = pl.BlockSpec((tile_m, out_pad), lambda l, i: (i, 0))

    scratch = [pltpu.VMEM((N, hid_pad), cdt),          # h double-buffer slot 0
               pltpu.VMEM((N, hid_pad), cdt),          # h double-buffer slot 1
               pltpu.VMEM((N, out_pad), jnp.float32)]  # JK-head accumulator

    # Advisory cost estimate (dominant terms).
    flops = 2 * N * N * (in_dim + L * hid_pad)                       # aggregations
    flops += 2 * N * in_dim * hid_pad                                # layer-1 proj
    flops += 2 * N * hid_pad * (hid_pad + out_pad) * max(L - 1, 0)   # mid layers + head
    flops += 2 * N * hid_pad * out_pad                               # last head term
    bytes_accessed = ((L + 1) * N * N * isz                          # A re-streamed per step
                      + N * _round_up(in_dim, 128) * isz
                      + sum(int(np.prod(a.shape)) * a.dtype.itemsize for a in in_arrays[3:])
                      + (L + 1) * N * 4 + N * out_pad * 4)

    # Explicit VMEM budget: 2x streaming blocks + resident params + scratch + margin.
    vmem_need = (2 * (tile_m * N * isz + tile_m * 128 * 4 + tile_m * out_pad * 4)
                 + 2 * (N * _round_up(in_dim, 128) * isz
                        + sum(int(np.prod(a.shape[:-1])) * _round_up(a.shape[-1], 128)
                              * a.dtype.itemsize for a in in_arrays[3:]))
                 + 2 * N * hid_pad * isz + N * out_pad * 4)
    vmem_limit = int(min(60 << 20, max(vmem_need + (4 << 20), 16 << 20)))

    kernel = partial(_jknet_kernel, num_layers=L, tile_m=tile_m)
    out_padded = pl.pallas_call(
        kernel,
        out_shape=jax.ShapeDtypeStruct((N, out_pad), jnp.float32),
        grid=(L + 1, n_tiles),
        in_specs=in_specs,
        out_specs=out_spec,
        scratch_shapes=scratch,
        compiler_params=pltpu.CompilerParams(
            # Row axis kept "arbitrary": layer step l+1 reads every row of h_l
            # from this core's VMEM scratch (see TODO at top re: v7x megacore).
            dimension_semantics=("arbitrary", "arbitrary"),
            vmem_limit_bytes=vmem_limit),
        cost_estimate=pl.CostEstimate(flops=int(flops), transcendentals=0,
                                      bytes_accessed=int(bytes_accessed)),
    )(*in_arrays)
    return out_padded[:, :out_dim]


def jknet_reference(A, feats, params):
    """Pure-JAX reference (DGL GraphConv norm='right' order of ops)."""
    deg = jnp.sum(A, axis=1, keepdims=True)
    dinv = 1.0 / jnp.clip(deg, 1.0, None)
    h = feats
    feat_lst = []
    for (W, b) in params["layers"]:
        h = jax.nn.relu(((A @ h) * dinv) @ W + b)
        feat_lst.append(h)
    hcat = jnp.concatenate(feat_lst, axis=-1)
    W_out, b_out = params["out"]
    return ((A @ hcat) * dinv) @ W_out + b_out


if __name__ == "__main__":
    def make_inputs(key, n, in_dim, density=0.10):
        k_adj, k_feat, k_par = jax.random.split(key, 3)
        A = (jax.random.uniform(k_adj, (n, n)) < density).astype(jnp.float32)
        A = jnp.maximum(A, jnp.eye(n, dtype=jnp.float32))   # self loops
        X = jax.random.normal(k_feat, (n, in_dim), jnp.float32)
        return A, X, k_par

    in_dim, hid_dim, out_dim = 16, 32, 8

    # Main config: N=256, 2 GraphConv layers, tile_m=128 -> 2 row tiles.
    N, L = 256, 2
    A, X, k_par = make_inputs(jax.random.PRNGKey(0), N, in_dim)
    params = init_jknet_params(k_par, in_dim, hid_dim, out_dim, L)
    ref = jknet_reference(A, X, params)

    out_f32 = jax.block_until_ready(
        jknet_forward(A, X, params, tile_m=128, compute_dtype=jnp.float32))
    np.testing.assert_allclose(np.asarray(out_f32), np.asarray(ref),
                               rtol=1e-4, atol=1e-4)
    assert out_f32.shape == (N, out_dim)

    # bf16 MXU operands (0/1 adjacency is bf16-exact), f32 accumulation/epilogue.
    # Activations are rounded to bf16 -> ~1% accuracy trade for MXU throughput.
    out_bf16 = jax.block_until_ready(
        jknet_forward(A, X, params, tile_m=128, compute_dtype=jnp.bfloat16))
    np.testing.assert_allclose(np.asarray(out_bf16), np.asarray(ref),
                               rtol=1e-1, atol=1e-1)

    # Edge configs: num_layers=1 (module default) and num_layers=3 (exercises
    # the middle-layer head accumulation), single row tile.
    for L2 in (1, 3):
        N2 = 128
        A2, X2, k_par2 = make_inputs(jax.random.PRNGKey(L2), N2, in_dim)
        p2 = init_jknet_params(k_par2, in_dim, hid_dim, out_dim, L2)
        o2 = jax.block_until_ready(jknet_forward(A2, X2, p2, compute_dtype=jnp.float32))
        np.testing.assert_allclose(np.asarray(o2),
                                   np.asarray(jknet_reference(A2, X2, p2)),
                                   rtol=1e-4, atol=1e-4)

    print("KERNEL_OK")
</pallas_src>

<mosaic_0001>
module attributes {stable_mosaic.version = 11 : i64} {
  func.func @_jknet_kernel(%arg0: i32, %arg1: i32, %arg2: memref<128x256xf32, #tpu.memory_space<vmem>>, %arg3: memref<128x1xf32, #tpu.memory_space<vmem>>, %arg4: memref<256x16xf32, #tpu.memory_space<vmem>>, %arg5: memref<16x128xf32, #tpu.memory_space<vmem>>, %arg6: memref<128x128xf32, #tpu.memory_space<vmem>>, %arg7: memref<1x128xf32, #tpu.memory_space<vmem>>, %arg8: memref<1x128xf32, #tpu.memory_space<vmem>>, %arg9: memref<128x128xf32, #tpu.memory_space<vmem>>, %arg10: memref<128x128xf32, #tpu.memory_space<vmem>>, %arg11: memref<1x128xf32, #tpu.memory_space<vmem>>, %arg12: memref<128x128xf32, #tpu.memory_space<vmem>>, %arg13: memref<256x128xf32, #tpu.memory_space<vmem>>, %arg14: memref<256x128xf32, #tpu.memory_space<vmem>>, %arg15: memref<256x128xf32, #tpu.memory_space<vmem>>) attributes {dimension_semantics = [#tpu.dimension_semantics<arbitrary>, #tpu.dimension_semantics<arbitrary>], iteration_bounds = array<i64: 3, 2>, scalar_prefetch = 0 : i64, scratch_operands = 3 : i64, tpu.core_type = #tpu.core_type<tc>, window_params = [{transform_indices = @transform_0, window_bounds = array<i64: 128, 256>}, {transform_indices = @transform_1, window_bounds = array<i64: 128, 1>}, {pipeline_mode = #tpu.pipeline_mode<synchronous>, transform_indices = @transform_2, window_bounds = array<i64: 256, 16>}, {pipeline_mode = #tpu.pipeline_mode<synchronous>, transform_indices = @transform_3, window_bounds = array<i64: 16, 128>}, {pipeline_mode = #tpu.pipeline_mode<synchronous>, transform_indices = @transform_4, window_bounds = array<i64: 128, 128>}, {pipeline_mode = #tpu.pipeline_mode<synchronous>, transform_indices = @transform_5, window_bounds = array<i64: 1, 128>}, {pipeline_mode = #tpu.pipeline_mode<synchronous>, transform_indices = @transform_6, window_bounds = array<i64: 1, 128>}, {pipeline_mode = #tpu.pipeline_mode<synchronous>, transform_indices = @transform_7, window_bounds = array<i64: 128, 128>}, {pipeline_mode = #tpu.pipeline_mode<synchronous>, transform_indices = @transform_8, window_bounds = array<i64: 128, 128>}, {pipeline_mode = #tpu.pipeline_mode<synchronous>, transform_indices = @transform_9, window_bounds = array<i64: 1, 128>}, {transform_indices = @transform_10, window_bounds = array<i64: 128, 128>}]} {
    %c128_i32 = arith.constant 128 : i32
    %0 = arith.muli %arg1, %c128_i32 : i32
    %1 = tpu.assume_multiple %0, 128 : i32
    %c0 = arith.constant 0 : index
    %c0_0 = arith.constant 0 : index
    %2 = vector.load %arg2[%c0, %c0_0] : memref<128x256xf32, #tpu.memory_space<vmem>>, vector<128x256xf32>
    %c0_1 = arith.constant 0 : index
    %c0_2 = arith.constant 0 : index
    %3 = vector.load %arg3[%c0_1, %c0_2] : memref<128x1xf32, #tpu.memory_space<vmem>>, vector<128x1xf32>
    %c0_i32 = arith.constant 0 : i32
    %4 = arith.cmpi eq, %arg0, %c0_i32 : i32
    %5 = arith.extui %4 : i1 to i32
    %c0_i32_3 = arith.constant 0 : i32
    %6 = arith.cmpi ne, %5, %c0_i32_3 : i32
    scf.if %6 {
      %c0_6 = arith.constant 0 : index
      %c0_7 = arith.constant 0 : index
      %13 = vector.load %arg4[%c0_6, %c0_7] : memref<256x16xf32, #tpu.memory_space<vmem>>, vector<256x16xf32>
      %cst = arith.constant dense<0.000000e+00> : vector<128x16xf32>
      %14 = tpu.matmul %2, %13, %cst {dimension_numbers = #tpu.dot_dimension_numbers<[1], [0], [0], [1], [0, 0, 1, 1], [], []>} : vector<128x256xf32>, vector<256x16xf32>, vector<128x16xf32> -> vector<128x16xf32>
      %15 = vector.broadcast %3 : vector<128x1xf32> to vector<128x16xf32>
      %16 = arith.mulf %14, %15 : vector<128x16xf32>
      %c0_8 = arith.constant 0 : index
      %c0_9 = arith.constant 0 : index
      %17 = vector.load %arg5[%c0_8, %c0_9] : memref<16x128xf32, #tpu.memory_space<vmem>>, vector<16x128xf32>
      %cst_10 = arith.constant dense<0.000000e+00> : vector<128x128xf32>
      %18 = tpu.matmul %16, %17, %cst_10 {dimension_numbers = #tpu.dot_dimension_numbers<[1], [0], [0], [1], [0, 0, 1, 1], [], []>} : vector<128x16xf32>, vector<16x128xf32>, vector<128x128xf32> -> vector<128x128xf32>
      %c0_11 = arith.constant 0 : index
      %c0_12 = arith.constant 0 : index
      %19 = vector.load %arg7[%c0_11, %c0_12] : memref<1x128xf32, #tpu.memory_space<vmem>>, vector<1x128xf32>
      %20 = vector.broadcast %19 : vector<1x128xf32> to vector<128x128xf32>
      %21 = arith.addf %18, %20 : vector<128x128xf32>
      %cst_13 = arith.constant 0.000000e+00 : f32
      %22 = vector.broadcast %cst_13 : f32 to vector<128x128xf32>
      %23 = arith.maximumf %21, %22 : vector<128x128xf32>
      %24 = arith.index_cast %1 : i32 to index
      %c0_14 = arith.constant 0 : index
      %25 = vector.load %arg13[%24, %c0_14] : memref<256x128xf32, #tpu.memory_space<vmem>>, vector<128x128xf32>
      tpu.vector_store %arg13[%24, %c0_14], %23 {strides = array<i32>} : memref<256x128xf32, #tpu.memory_space<vmem>>, vector<128x128xf32>,
    } else {
    }
    %c1_i32 = arith.constant 1 : i32
    %7 = arith.cmpi eq, %arg0, %c1_i32 : i32
    %8 = arith.extui %7 : i1 to i32
    %c0_i32_4 = arith.constant 0 : i32
    %9 = arith.cmpi ne, %8, %c0_i32_4 : i32
    scf.if %9 {
      %c0_6 = arith.constant 0 : index
      %c0_7 = arith.constant 0 : index
      %13 = vector.load %arg13[%c0_6, %c0_7] : memref<256x128xf32, #tpu.memory_space<vmem>>, vector<256x128xf32>
      %cst = arith.constant dense<0.000000e+00> : vector<128x128xf32>
      %14 = tpu.matmul %2, %13, %cst {dimension_numbers = #tpu.dot_dimension_numbers<[1], [0], [0], [1], [0, 0, 1, 1], [], []>} : vector<128x256xf32>, vector<256x128xf32>, vector<128x128xf32> -> vector<128x128xf32>
      %15 = vector.broadcast %3 : vector<128x1xf32> to vector<128x128xf32>
      %16 = arith.mulf %14, %15 : vector<128x128xf32>
      %c0_8 = arith.constant 0 : index
      %c0_9 = arith.constant 0 : index
      %17 = vector.load %arg9[%c0_8, %c0_9] : memref<128x128xf32, #tpu.memory_space<vmem>>, vector<128x128xf32>
      %cst_10 = arith.constant dense<0.000000e+00> : vector<128x128xf32>
      %18 = tpu.matmul %16, %17, %cst_10 {dimension_numbers = #tpu.dot_dimension_numbers<[1], [0], [0], [1], [0, 0, 1, 1], [], []>} : vector<128x128xf32>, vector<128x128xf32>, vector<128x128xf32> -> vector<128x128xf32>
      %19 = arith.index_cast %1 : i32 to index
      %c0_11 = arith.constant 0 : index
      %20 = vector.load %arg15[%19, %c0_11] : memref<256x128xf32, #tpu.memory_space<vmem>>, vector<128x128xf32>
      tpu.vector_store %arg15[%19, %c0_11], %18 {strides = array<i32>} : memref<256x128xf32, #tpu.memory_space<vmem>>, vector<128x128xf32>,
      %c0_12 = arith.constant 0 : index
      %c0_13 = arith.constant 0 : index
      %21 = vector.load %arg6[%c0_12, %c0_13] : memref<128x128xf32, #tpu.memory_space<vmem>>, vector<128x128xf32>
      %cst_14 = arith.constant dense<0.000000e+00> : vector<128x128xf32>
      %22 = tpu.matmul %16, %21, %cst_14 {dimension_numbers = #tpu.dot_dimension_numbers<[1], [0], [0], [1], [0, 0, 1, 1], [], []>} : vector<128x128xf32>, vector<128x128xf32>, vector<128x128xf32> -> vector<128x128xf32>
      %c0_15 = arith.constant 0 : index
      %c0_16 = arith.constant 0 : index
      %23 = vector.load %arg8[%c0_15, %c0_16] : memref<1x128xf32, #tpu.memory_space<vmem>>, vector<1x128xf32>
      %24 = vector.broadcast %23 : vector<1x128xf32> to vector<128x128xf32>
      %25 = arith.addf %22, %24 : vector<128x128xf32>
      %cst_17 = arith.constant 0.000000e+00 : f32
      %26 = vector.broadcast %cst_17 : f32 to vector<128x128xf32>
      %27 = arith.maximumf %25, %26 : vector<128x128xf32>
      %28 = arith.index_cast %1 : i32 to index
      %c0_18 = arith.constant 0 : index
      %29 = vector.load %arg14[%28, %c0_18] : memref<256x128xf32, #tpu.memory_space<vmem>>, vector<128x128xf32>
      tpu.vector_store %arg14[%28, %c0_18], %27 {strides = array<i32>} : memref<256x128xf32, #tpu.memory_space<vmem>>, vector<128x128xf32>,
    } else {
    }
    %c2_i32 = arith.constant 2 : i32
    %10 = arith.cmpi eq, %arg0, %c2_i32 : i32
    %11 = arith.extui %10 : i1 to i32
    %c0_i32_5 = arith.constant 0 : i32
    %12 = arith.cmpi ne, %11, %c0_i32_5 : i32
    scf.if %12 {
      %c0_6 = arith.constant 0 : index
      %c0_7 = arith.constant 0 : index
      %13 = vector.load %arg14[%c0_6, %c0_7] : memref<256x128xf32, #tpu.memory_space<vmem>>, vector<256x128xf32>
      %cst = arith.constant dense<0.000000e+00> : vector<128x128xf32>
      %14 = tpu.matmul %2, %13, %cst {dimension_numbers = #tpu.dot_dimension_numbers<[1], [0], [0], [1], [0, 0, 1, 1], [], []>} : vector<128x256xf32>, vector<256x128xf32>, vector<128x128xf32> -> vector<128x128xf32>
      %15 = vector.broadcast %3 : vector<128x1xf32> to vector<128x128xf32>
      %16 = arith.mulf %14, %15 : vector<128x128xf32>
      %c0_8 = arith.constant 0 : index
      %c0_9 = arith.constant 0 : index
      %17 = vector.load %arg10[%c0_8, %c0_9] : memref<128x128xf32, #tpu.memory_space<vmem>>, vector<128x128xf32>
      %cst_10 = arith.constant dense<0.000000e+00> : vector<128x128xf32>
      %18 = tpu.matmul %16, %17, %cst_10 {dimension_numbers = #tpu.dot_dimension_numbers<[1], [0], [0], [1], [0, 0, 1, 1], [], []>} : vector<128x128xf32>, vector<128x128xf32>, vector<128x128xf32> -> vector<128x128xf32>
      %19 = arith.index_cast %1 : i32 to index
      %c0_11 = arith.constant 0 : index
      %20 = vector.load %arg15[%19, %c0_11] : memref<256x128xf32, #tpu.memory_space<vmem>>, vector<128x128xf32>
      %21 = arith.addf %20, %18 : vector<128x128xf32>
      %c0_12 = arith.constant 0 : index
      %c0_13 = arith.constant 0 : index
      %22 = vector.load %arg11[%c0_12, %c0_13] : memref<1x128xf32, #tpu.memory_space<vmem>>, vector<1x128xf32>
      %23 = vector.broadcast %22 : vector<1x128xf32> to vector<128x128xf32>
      %24 = arith.addf %21, %23 : vector<128x128xf32>
      %c0_14 = arith.constant 0 : index
      %c0_15 = arith.constant 0 : index
      %25 = vector.load %arg12[%c0_14, %c0_15] : memref<128x128xf32, #tpu.memory_space<vmem>>, vector<128x128xf32>
      tpu.vector_store %arg12[%c0_14, %c0_15], %24 {strides = array<i32>} : memref<128x128xf32, #tpu.memory_space<vmem>>, vector<128x128xf32>,
    } else {
    }
    return
  }
  func.func @transform_0(%arg0: i32, %arg1: i32) -> (i32, i32) {
    %c0_i32 = arith.constant 0 : i32
    %c0_i32_0 = arith.constant 0 : i32
    return %arg1, %c0_i32 : i32, i32
  }
  func.func @transform_1(%arg0: i32, %arg1: i32) -> (i32, i32) {
    %c0_i32 = arith.constant 0 : i32
    %c0_i32_0 = arith.constant 0 : i32
    return %arg1, %c0_i32 : i32, i32
  }
  func.func @transform_2(%arg0: i32, %arg1: i32) -> (i32, i32) {
    %c0_i32 = arith.constant 0 : i32
    %c0_i32_0 = arith.constant 0 : i32
    %c0_i32_1 = arith.constant 0 : i32
    return %c0_i32, %c0_i32_0 : i32, i32
  }
  func.func @transform_3(%arg0: i32, %arg1: i32) -> (i32, i32) {
    %c0_i32 = arith.constant 0 : i32
    %c0_i32_0 = arith.constant 0 : i32
    %c0_i32_1 = arith.constant 0 : i32
    return %c0_i32, %c0_i32_0 : i32, i32
  }
  func.func @transform_4(%arg0: i32, %arg1: i32) -> (i32, i32) {
    %c0_i32 = arith.constant 0 : i32
    %c0_i32_0 = arith.constant 0 : i32
    %c0_i32_1 = arith.constant 0 : i32
    return %c0_i32, %c0_i32_0 : i32, i32
  }
  func.func @transform_5(%arg0: i32, %arg1: i32) -> (i32, i32) {
    %c0_i32 = arith.constant 0 : i32
    %c0_i32_0 = arith.constant 0 : i32
    %c0_i32_1 = arith.constant 0 : i32
    return %c0_i32, %c0_i32_0 : i32, i32
  }
  func.func @transform_6(%arg0: i32, %arg1: i32) -> (i32, i32) {
    %c0_i32 = arith.constant 0 : i32
    %c0_i32_0 = arith.constant 0 : i32
    %c0_i32_1 = arith.constant 0 : i32
    return %c0_i32, %c0_i32_0 : i32, i32
  }
  func.func @transform_7(%arg0: i32, %arg1: i32) -> (i32, i32) {
    %c0_i32 = arith.constant 0 : i32
    %c0_i32_0 = arith.constant 0 : i32
    %c0_i32_1 = arith.constant 0 : i32
    return %c0_i32, %c0_i32_0 : i32, i32
  }
  func.func @transform_8(%arg0: i32, %arg1: i32) -> (i32, i32) {
    %c0_i32 = arith.constant 0 : i32
    %c0_i32_0 = arith.constant 0 : i32
    %c0_i32_1 = arith.constant 0 : i32
    return %c0_i32, %c0_i32_0 : i32, i32
  }
  func.func @transform_9(%arg0: i32, %arg1: i32) -> (i32, i32) {
    %c0_i32 = arith.constant 0 : i32
    %c0_i32_0 = arith.constant 0 : i32
    %c0_i32_1 = arith.constant 0 : i32
    return %c0_i32, %c0_i32_0 : i32, i32
  }
  func.func @transform_10(%arg0: i32, %arg1: i32) -> (i32, i32) {
    %c0_i32 = arith.constant 0 : i32
    %c0_i32_0 = arith.constant 0 : i32
    return %arg1, %c0_i32 : i32, i32
  }
}

</mosaic_0001>

<bundles_post_ra>
// kernel: tpu_custom_call.1
= control target key start
LH: loop header
LB: loop body
LE: loop exit
PB: predicated region body
PF: predicated region fallthrough
CT: control target
= control target key end

     0   :  { %s4371_s0 = inlined_call_operand.vmem [shape: f32[256,256], index: 0, kind: input, shape index: {}]   ;;  %s4372_s1 = inlined_call_operand.vmem [shape: f32[256,1], index: 1, kind: input, shape index: {}]   ;;  %s4373_s2 = inlined_call_operand.vmem [shape: f32[256,16], index: 2, kind: input, shape index: {}]   ;;  %s4374_s3 = inlined_call_operand.hbm [shape: f32[16,128], index: 3, kind: input, shape index: {}]   ;;  %s4375_s4 = inlined_call_operand.hbm [shape: f32[128,128], index: 4, kind: input, shape index: {}]   ;;  %s4376_s5 = inlined_call_operand.vmem [shape: f32[1,128], index: 5, kind: input, shape index: {}]   ;;  %s4377_s6 = inlined_call_operand.vmem [shape: f32[1,128], index: 6, kind: input, shape index: {}]   ;;  %s4378_s7 = inlined_call_operand.hbm [shape: f32[128,128], index: 7, kind: input, shape index: {}]   ;;  %s4379_s8 = inlined_call_operand.hbm [shape: f32[128,128], index: 8, kind: input, shape index: {}]   ;;  %s4380_s9 = inlined_call_operand.vmem [shape: f32[1,128], index: 9, kind: input, shape index: {}]   ;;  %s4381_s10 = inlined_call_operand.hbm [shape: f32[256,128], index: 10, kind: output, shape index: {}]  }
   0x1   :  { %4411 = sst [smem:[#allocation42_spill]] %s4375_s4 }
   0x2   :  { %4412 = sst [smem:[#allocation43_spill]] %s4381_s10 }
   0x3   :  { %15 = vsyncpa [#allocation6], 0 }
   0x4   :  { %16 = vsyncpa [#allocation9], 0 }
   0x5   :  { %17 = vsyncpa [#allocation12], 0 }
   0x6   :  { %18 = vsyncpa [#allocation7], 0 }
   0x7   :  { %20 = vsyncpa [#allocation7 + $0x1], 0  ;;  %s3556_s13 = smov 0   ;;  %s3558_s14 = smov 0  }
   0x8   :  { %s3560_s15 = smov 0   ;;  %s3562_s16 = smov 0  }
   0x9   :  { %s3564_s17 = smov 0   ;;  %s3566_s18 = smov 0  }
   0xa   :  { %s3568_s19 = smov 0   ;;  %s3570_s20 = smov 0  }
   0xb LB: > { %4413 = sst [smem:[#allocation18_spill]] %s3459_s13  ;;  %s2333_s21 = sadd.s32 4294967295, %s3487_s20   ;;  %s3487_s20 = sphi %s3570_s20, %s26_s20   ;;  %s3483_s19 = sphi %s3568_s19, %s4478_s19   ;;  %s3479_s18 = sphi %s3566_s18, %s4477_s18   ;;  %s3475_s17 = sphi %s3564_s17, %s4476_s17   ;;  %s3471_s16 = sphi %s3562_s16, %s4481_s16   ;;  %s3467_s15 = sphi %s3560_s15, %s4474_s15   ;;  %s3463_s14 = sphi %s3558_s14, %s4480_s14   ;;  %s3459_s13 = sphi %s3556_s13, %s4479_s13  }
   0xc   : > { %4414 = sst [smem:[#allocation19_spill]] %s3467_s15  ;;  %s2334_s22 = sadd.s32 4294967294, %s3487_s20  }
   0xd   : > { %4415 = sst [smem:[#allocation20_spill]] %s3479_s18  ;;  %s35_s23 = sadd.s32 1, %s3479_s18 }
   0xe   : > { %4416 = sst [smem:[#allocation21_spill]] %s3483_s19  ;;  %s38_s24 = sadd.s32 1, %s3483_s19 }
   0xf   : > { %4417 = sst [smem:[#allocation22_spill]] %s3487_s20  ;;  %p36_p0 = scmp.ge.s32.totalorder %s35_s23, 2 }
  0x10   : > { %s265_s25 = sadd.s32 1, %s3467_s15  ;;  %p275_p1 = scmp.ne.s32.totalorder %s3467_s15, %s3463_s14 }
  0x11   : > { %p276_p2 = scmp.eq.s32.totalorder %s2333_s21, 5  ;;  %s4483_s23 = smov (%p36_p0, %s35_s23), 0 }
  0x12   : > { %4418 = sst [smem:[#allocation23_spill]] %s4483_s23  ;;  %s4485_s24 = smov (!%p36_p0, %s38_s24), %s3483_s19 }
  0x13   : > { %s262_s26 = ssub.s32 %s3479_s18, %s4483_s23  ;;  %p3608_p3 = por %p276_p2, %p275_p1 }
  0x14   : > { %p40_p4 = scmp.ge.s32.totalorder %s4485_s24, 3  ;;  %p263_p5 = scmp.eq.s32.totalorder %s262_s26, 0 }
  0x15   : > { %s4419_s27 = scalar_select %p3608_p3, 1, 0 }
  0x16   : > { %p281_p6 = scmp.ne.s32.totalorder %s3463_s14, %s3459_s13  ;;  %p282_p7 = scmp.eq.s32.totalorder %s2334_s22, 5 }
  0x17   : > { %4420 = sst [smem:[#allocation24_spill]] %s4419_s27  ;;  %s4487_s24 = smov (%p40_p4, %s4485_s24), 0 }
  0x18   : > { %4421 = sst [smem:[#allocation25_spill]] %s4487_s24  ;;  %p3619_p8 = por %p282_p7, %p281_p6 }
  0x19   : > { %s3617_s28 = scalar_select %p263_p5, %s3467_s15, %s265_s25  }
  0x1a   : > { %s4423_s29 = scalar_select %p3619_p8, 1, 0 }
  0x1b   : > { %4422 = sst [smem:[#allocation26_spill]] %s3617_s28  ;;  %p2335_p9 = scmp.ge.s32.totalorder %s3487_s20, 1 }
  0x1c   : > { %4424 = sst [smem:[#allocation27_spill]] %s4423_s29  ;;  %p289_p10 = scmp.lt.s32.totalorder %s3487_s20, 7 }
  0x1d   : > { %p3625_p11 = scmp.eq.s32.totalorder %s2333_s21, 0  ;;  %s3489_s12 = smov [#allocation8]  }
  0x1e   : > { %p3629_p12 = pnand %p2335_p9, %p289_p10  ;;  %s317_s22 = sshll.u32 %s3489_s12, 4  ;;  %s318_s22 = int_to_ptr.vmem [resolvable:$true] %s317_s22 }
  0x1f   : > { %s4425_s30 = scalar_select %p3625_p11, 1, 0 }
  0x20   : > { %s4426_s11 = scalar_select %p3629_p12, 1, 0 }
  0x21   : > { %p3162_p13 = pneg %p3629_p12  ;;  %s3490_s21 = smov [#allocation5]  }
  0x22   : > { %s304_s26 = sshll.u32 %s3490_s21, 4  ;;  %s4428_s4 = sld [smem:[#allocation42_spill]]  ;;  %s305_s26 = int_to_ptr.vmem [resolvable:$true] %s304_s26 }
  0x23   : > { %p3637_p0 = pnand %p3625_p11, %p3162_p13 }
  0x25   : > { %p3649_p2 = pneg %p3637_p0 }
  0x28   : > { %s3269_s19 = scalar_lea.hbm %s4428_s4, 2048 }
  0x29   : > { %p3270_p1 = scmp.ne.s32.totalorder %s4428_s4, %s3269_s19  ;;  %p3276_p6 = scmp.lt.u32.totalorder %s3269_s19, %s4428_s4 }
  0x2b   : > { %p3272_p4 = pnand %p3649_p2, %p3270_p1 }
  0x2d   : > { %p3273_p5 = pneg %p3272_p4 }
  0x2f   : > { %p3278_p7 = pnand %p3276_p6, %p3273_p5 }
  0x31   : > { %3281 = shalt.err (!%p3278_p7)
}
  0x32   : > { %s3282_s23 = scalar_lea.vmem %s318_s22, 2048  ;;  %p3290_p8 = scmp.lt.s32.totalorder %s318_s22, %s318_s22 }
  0x33   : > { %p3283_p9 = scmp.ne.s32.totalorder %s318_s22, %s3282_s23  ;;  %p3291_p3 = scmp.lt.s32.totalorder %s3282_s23, %s3282_s23 }
  0x35   : > { %p3285_p10 = pnand %p3283_p9, %p3649_p2  ;;  %p3292_p11 = por %p3291_p3, %p3290_p8 }
  0x37   : > { %p3286_p13 = pneg %p3285_p10 }
  0x39   : > { %p3293_p12 = pnand %p3292_p11, %p3286_p13 }
  0x3b   : > { %3296 = shalt.err (!%p3293_p12)
}
  0x3c   : > { %s3491_s18 = smov 128   ;;  %s3492_s24 = smov 8  }
  0x3d   : > { %3168 = dma.hbm_to_vmem [thread:$0]  (!%p3637_p0), %s4428_s4, 2048, %s318_s22, [#allocation9], %s3491_s18, %s3491_s18, %s3492_s24  }
  0x3e   : > { %s3297_s21 = scalar_lea.hbm %s4374_s3, 256 }
  0x3f   : > { %p3298_p3 = scmp.ne.s32.totalorder %s4374_s3, %s3297_s21  ;;  %p3304_p12 = scmp.lt.u32.totalorder %s3297_s21, %s4374_s3 }
  0x41   : > { %p3300_p8 = pnand %p3298_p3, %p3649_p2 }
  0x43   : > { %p3301_p11 = pneg %p3300_p8 }
  0x45   : > { %p3306_p1 = pnand %p3304_p12, %p3301_p11 }
  0x47   : > { %3309 = shalt.err (!%p3306_p1)
}
  0x48   : > { %s3310_s15 = scalar_lea.vmem %s305_s26, 256  ;;  %p3318_p7 = scmp.lt.s32.totalorder %s305_s26, %s305_s26 }
  0x49   : > { %p3311_p4 = scmp.ne.s32.totalorder %s305_s26, %s3310_s15  ;;  %p3319_p9 = scmp.lt.s32.totalorder %s3310_s15, %s3310_s15 }
  0x4b   : > { %p3313_p5 = pnand %p3311_p4, %p3649_p2  ;;  %p3320_p10 = por %p3319_p9, %p3318_p7 }
  0x4d   : > { %p3314_p6 = pneg %p3313_p5 }
  0x4f   : > { %p3321_p13 = pnand %p3320_p10, %p3314_p6 }
  0x51   : > { %3324 = shalt.err (!%p3321_p13)
}
  0x52   : > { %3165 = dma.hbm_to_vmem [thread:$0]  (!%p3637_p0), %s4374_s3, 256, %s305_s26, [#allocation6], %s3491_s18, %s3491_s18, %s3492_s24  }
  0x53   : > { %s3493_s20 = smov [#allocation10]   ;;  %s3494_s19 = smov [#allocation11]  }
  0x54   : > { %s336_s22 = sshll.u32 %s3493_s20, 4  ;;  %s349_s28 = sshll.u32 %s3494_s19, 4  ;;  %s337_s22 = int_to_ptr.vmem [resolvable:$true] %s336_s22  ;;  %s350_s28 = int_to_ptr.vmem [resolvable:$true] %s349_s28 }
  0x55   : > { %s3325_s23 = scalar_lea.hbm %s4378_s7, 2048 }
  0x56   : > { %p3326_p3 = scmp.ne.s32.totalorder %s4378_s7, %s3325_s23  ;;  %p3332_p12 = scmp.lt.u32.totalorder %s3325_s23, %s4378_s7 }
  0x58   : > { %p3328_p8 = pnand %p3326_p3, %p3649_p2 }
  0x5a   : > { %p3329_p11 = pneg %p3328_p8 }
  0x5c   : > { %p3334_p1 = pnand %p3332_p12, %p3329_p11 }
  0x5e   : > { %3337 = shalt.err (!%p3334_p1)
}
  0x5f   : > { %s3338_s26 = scalar_lea.vmem %s337_s22, 2048  ;;  %p3346_p7 = scmp.lt.s32.totalorder %s337_s22, %s337_s22 }
  0x60   : > { %p3339_p4 = scmp.ne.s32.totalorder %s337_s22, %s3338_s26  ;;  %p3347_p9 = scmp.lt.s32.totalorder %s3338_s26, %s3338_s26 }
  0x62   : > { %p3341_p5 = pnand %p3339_p4, %p3649_p2  ;;  %p3348_p10 = por %p3347_p9, %p3346_p7 }
  0x64   : > { %p3342_p6 = pneg %p3341_p5 }
  0x66   : > { %p3349_p13 = pnand %p3348_p10, %p3342_p6 }
  0x68   : > { %3352 = shalt.err (!%p3349_p13)
}
  0x69   : > { %3171 = dma.hbm_to_vmem [thread:$0]  (!%p3637_p0), %s4378_s7, 2048, %s337_s22, [#allocation9], %s3491_s18, %s3491_s18, %s3492_s24  }
  0x6a   : > { %s3353_s19 = scalar_lea.hbm %s4379_s8, 2048 }
  0x6b   : > { %p3354_p3 = scmp.ne.s32.totalorder %s4379_s8, %s3353_s19  ;;  %p3360_p12 = scmp.lt.u32.totalorder %s3353_s19, %s4379_s8 }
  0x6d   : > { %p3356_p8 = pnand %p3354_p3, %p3649_p2 }
  0x6f   : > { %p3357_p11 = pneg %p3356_p8 }
  0x71   : > { %p3362_p1 = pnand %p3360_p12, %p3357_p11 }
  0x73   : > { %3365 = shalt.err (!%p3362_p1)
}
  0x74   : > { %s3366_s10 = scalar_lea.vmem %s350_s28, 2048  ;;  %p3374_p7 = scmp.lt.s32.totalorder %s350_s28, %s350_s28 }
  0x75   : > { %p3367_p4 = scmp.ne.s32.totalorder %s350_s28, %s3366_s10  ;;  %p3375_p9 = scmp.lt.s32.totalorder %s3366_s10, %s3366_s10 }
  0x77   : > { %p3369_p5 = pnand %p3367_p4, %p3649_p2  ;;  %p3376_p10 = por %p3375_p9, %p3374_p7 }
  0x79   : > { %p3370_p6 = pneg %p3369_p5 }
  0x7b   : > { %p3377_p13 = pnand %p3376_p10, %p3370_p6 }
  0x7d   : > { %3380 = shalt.err (!%p3377_p13)
}
  0x7e   : > { %3174 = dma.hbm_to_vmem [thread:$0]  (!%p3637_p0), %s4379_s8, 2048, %s350_s28, [#allocation12], %s3491_s18, %s3491_s18, %s3492_s24  }
  0x7f   : > { %p4430_p3 = scmp.ne.s32.totalorder %s4426_s11, 0 }
  0x81   : > { %387 = sbr.rel (%p4430_p3) target bundleno = 1817 (0x719), region = 60 }
  0x88   : > { %p4431_p2 = scmp.ne.s32.totalorder %s4425_s30, 0 }
  0x8a   : > { %3442 = dma.done.wait (%p4431_p2), [#allocation6], 256  }
  0x8b   : > { %3444 = vsyncadd (%p4431_p2), [#allocation6], 4294967040 }
  0x8c   : > { %3446 = dma.done.wait (%p4431_p2), [#allocation9], 4096  }
  0x8d   : > { %3448 = vsyncadd (%p4431_p2), [#allocation9], 4294963200 }
  0x8e   : > { %3450 = dma.done.wait (%p4431_p2), [#allocation12], 2048  }
  0x8f   : > { %3452 = vsyncadd (%p4431_p2), [#allocation12], 4294965248  ;;  %s2347_s11 = sshll.u32 %s3471_s16, 4  ;;  %s440_s25 = sand.u32 1, %s3463_s14  }
  0x90   : > { %p444_p0 = scmp.lt.s32.totalorder %s2347_s11, 31  ;;  %s3749_s12 = sshll.u32 %s440_s25, 7 }
  0x91   : > { %s3752_s18 = sshll.u32 %s3471_s16, 7  ;;  %s3891_s29 = scalar_lea.vmem [#allocation13], %s3749_s12 }
  0x92   : > { %s4489_s11 = smov (!%p444_p0, %s2347_s11), 31  ;;  %p2353_p8 = scmp.ne.s32.totalorder %s3475_s17, 0 }
  0x93   : > { %s2380_s24 = sshll.u32 %s4489_s11, 4  ;;  %s2351_s30 = sshll.u32 %s4489_s11, 3  ;;  %v526_v48 = vld [vmem:[%s4373_s2 + $0x80] sm:$0xff] (!%p2353_p8)  ;;  %v527_v49 = vld [vmem:[%s4373_s2 + $0x88] sm:$0xff] (!%p2353_p8)  ;;  %v528_v53 = vld [vmem:[%s4373_s2 + $0x90] sm:$0xff] (!%p2353_p8)  ;;  %v3495_v55 = vmov (!%p2353_p8), 0  }
  0x94   : > { %s3757_s27 = scalar_lea.vmem %s4371_s0, %s2380_s24  ;;  %s454_s19 = scalar_lea.vmem %s4372_s1, %s2351_s30  ;;  %v510_v50 = vld [vmem:[%s4373_s2] sm:$0xff] (!%p2353_p8)  ;;  %v2932_v51 = vpack.c.bf16 (!%p2353_p8), %v527_v49, %v526_v48  ;;  %v511_v52 = vld [vmem:[%s4373_s2 + $0x8] sm:$0xff] (!%p2353_p8)  ;;  %v529_v54 = vld [vmem:[%s4373_s2 + $0x98] sm:$0xff] (!%p2353_p8)  ;;  %3263 = vset.pattern.permute.xlu0 (!%p2353_p8), %v3495_v55  ;;  %3264 = vset.pattern.permute.xlu1 (!%p2353_p8), %v3495_v55  ;;  %vm792_vm0 = vcmask (!%p2353_p8), 130048  }
  0x95   : > { %v3760_v0 = vld [vmem:[%s3757_s27] sm:$0xff]  ;;  %v3763_v1 = vld [vmem:[%s3757_s27 + $0x8] sm:$0xff]  ;;  %v3766_v2 = vld [vmem:[%s3757_s27 + $0x10] sm:$0xff]  ;;  %v2934_v56 = vpack.c.bf16 (!%p2353_p8), %v511_v52, %v510_v50  ;;  %v2936_v57 = vpack.c.bf16 (!%p2353_p8), %v529_v54, %v528_v53  ;;  %s4067_s15 = scalar_lea.vmem (!%p2353_p8), [#allocation2], %s3752_s18 }
  0x96   : > { %v3769_v3 = vld [vmem:[%s3757_s27 + $0x18] sm:$0xff]  ;;  %v3772_v4 = vld [vmem:[%s3757_s27 + $0x20] sm:$0xff]  ;;  %v3775_v5 = vld [vmem:[%s3757_s27 + $0x28] sm:$0xff]  ;;  %606 = vmatprep.mubr.f32.mxu0 (!%p2353_p8), %v3763_v1  ;;  %2933 = vmatprep.subr.bf16.mxu0 (!%p2353_p8), %v2932_v51 }
  0x97   : > { %v3778_v6 = vld [vmem:[%s3757_s27 + $0x30] sm:$0xff]  ;;  %v3781_v7 = vld [vmem:[%s3757_s27 + $0x38] sm:$0xff]  ;;  %v3784_v8 = vld [vmem:[%s3757_s27 + $0x40] sm:$0xff]  ;;  %3128 = vmatprep.subr.bf16.mxu1 (!%p2353_p8), %v2932_v51  ;;  %2935 = vmatpush3.bf16.msra.mxu0 (!%p2353_p8), %v2934_v56 }
  0x98   : > { %v3787_v9 = vld [vmem:[%s3757_s27 + $0x48] sm:$0xff]  ;;  %v3790_v10 = vld [vmem:[%s3757_s27 + $0x50] sm:$0xff]  ;;  %v3793_v11 = vld [vmem:[%s3757_s27 + $0x58] sm:$0xff]  ;;  %3136 = vmatpush3.bf16.msra.mxu1 (!%p2353_p8), %v2934_v56  ;;  %2937 = vmatprep.subr.bf16.mxu0 (!%p2353_p8), %v2936_v57 }
  0x99   : > { %v3796_v12 = vld [vmem:[%s3757_s27 + $0x60] sm:$0xff]  ;;  %v3799_v13 = vld [vmem:[%s3757_s27 + $0x68] sm:$0xff]  ;;  %v3802_v14 = vld [vmem:[%s3757_s27 + $0x70] sm:$0xff]  ;;  %3129 = vmatprep.subr.bf16.mxu1 (!%p2353_p8), %v2936_v57 }
  0x9a   : > { %v3805_v15 = vld [vmem:[%s3757_s27 + $0x78] sm:$0xff]  ;;  %v3808_v16 = vld [vmem:[%s3757_s27 + $0x80] sm:$0xff]  ;;  %v3811_v17 = vld [vmem:[%s3757_s27 + $0x88] sm:$0xff] }
  0x9b   : > { %v3814_v18 = vld [vmem:[%s3757_s27 + $0x90] sm:$0xff]  ;;  %v3817_v19 = vld [vmem:[%s3757_s27 + $0x98] sm:$0xff]  ;;  %v3820_v20 = vld [vmem:[%s3757_s27 + $0xa0] sm:$0xff] }
  0x9c   : > { %4432 = vst [vmem:[#allocation28_spill] sm:$0xff] %v3814_v18  ;;  %4433 = vst [vmem:[#allocation29_spill] sm:$0xff] %v3817_v19  ;;  %v3826_v21 = vld [vmem:[%s3757_s27 + $0xa8] sm:$0xff]  ;;  %v3829_v22 = vld [vmem:[%s3757_s27 + $0xb0] sm:$0xff] }
  0x9d   : > { %4434 = vst [vmem:[#allocation30_spill] sm:$0xff] %v3820_v20  ;;  %4435 = vst [vmem:[#allocation31_spill] sm:$0xff] %v3826_v21  ;;  %v3832_v23 = vld [vmem:[%s3757_s27 + $0xb8] sm:$0xff]  ;;  %v3835_v24 = vld [vmem:[%s3757_s27 + $0xc0] sm:$0xff] }
  0x9e   : > { %4436 = vst [vmem:[#allocation32_spill] sm:$0xff] %v3829_v22  ;;  %4437 = vst [vmem:[#allocation33_spill] sm:$0xff] %v3832_v23  ;;  %v3838_v25 = vld [vmem:[%s3757_s27 + $0xc8] sm:$0xff]  ;;  %v3841_v26 = vld [vmem:[%s3757_s27 + $0xd0] sm:$0xff] }
  0x9f   : > { %4438 = vst [vmem:[#allocation34_spill] sm:$0xff] %v3835_v24  ;;  %4439 = vst [vmem:[#allocation35_spill] sm:$0xff] %v3838_v25  ;;  %v3844_v27 = vld [vmem:[%s3757_s27 + $0xd8] sm:$0xff]  ;;  %v3847_v28 = vld [vmem:[%s3757_s27 + $0xe0] sm:$0xff]  ;;  %666 = vmatprep.mubr.f32.mxu1 (!%p2353_p8), %v3838_v25 }
  0xa0   : > { %4440 = vst [vmem:[#allocation36_spill] sm:$0xff] %v3841_v26  ;;  %4441 = vst [vmem:[#allocation37_spill] sm:$0xff] %v3844_v27  ;;  %v3850_v29 = vld [vmem:[%s3757_s27 + $0xe8] sm:$0xff]  ;;  %v3853_v30 = vld [vmem:[%s3757_s27 + $0xf0] sm:$0xff] }
  0xa1   : > { %4442 = vst [vmem:[#allocation38_spill] sm:$0xff] %v3847_v28  ;;  %4443 = vst [vmem:[#allocation39_spill] sm:$0xff] %v3850_v29  ;;  %v3856_v31 = vld [vmem:[%s3757_s27 + $0xf8] sm:$0xff]  ;;  %v3858_v32 = vld [vmem:[%s454_s19] sm:$0xff]  ;;  %509 = sbr.rel (%p2353_p8) target bundleno = 685 (0x2ad), region = 80 }
  0xa2   : > { %4444 = vst [vmem:[#allocation40_spill] sm:$0xff] %v3853_v30  ;;  %4445 = vst [vmem:[#allocation41_spill] sm:$0xff] %v3856_v31  ;;  %v3860_v33 = vld [vmem:[%s454_s19 + $0x8] sm:$0xff]  ;;  %v3862_v34 = vld [vmem:[%s454_s19 + $0x10] sm:$0xff]  ;;  %689 = vperm.xlu0 (!%p2353_p8), %3263, %v3858_v32  }
  0xa3   : > { %v3864_v35 = vld [vmem:[%s454_s19 + $0x18] sm:$0xff]  ;;  %v3866_v36 = vld [vmem:[%s454_s19 + $0x20] sm:$0xff]  ;;  %v3868_v37 = vld [vmem:[%s454_s19 + $0x28] sm:$0xff]  ;;  %699 = vperm.xlu1 (!%p2353_p8), %3264, %v3862_v34  }
  0xa4   : > { %v3870_v38 = vld [vmem:[%s454_s19 + $0x30] sm:$0xff]  ;;  %v3872_v39 = vld [vmem:[%s454_s19 + $0x38] sm:$0xff]  ;;  %v3874_v40 = vld [vmem:[%s454_s19 + $0x40] sm:$0xff] }
  0xa5   : > { %v3876_v41 = vld [vmem:[%s454_s19 + $0x48] sm:$0xff]  ;;  %v3878_v42 = vld [vmem:[%s454_s19 + $0x50] sm:$0xff]  ;;  %v3880_v43 = vld [vmem:[%s454_s19 + $0x58] sm:$0xff] }
  0xa6   : > { %v3882_v44 = vld [vmem:[%s454_s19 + $0x60] sm:$0xff]  ;;  %v3884_v45 = vld [vmem:[%s454_s19 + $0x68] sm:$0xff]  ;;  %v3886_v46 = vld [vmem:[%s454_s19 + $0x70] sm:$0xff]  ;;  %694 = vperm.xlu0 (!%p2353_p8), %3263, %v3860_v33  }
  0xa7   : > { %v3888_v47 = vld [vmem:[%s454_s19 + $0x78] sm:$0xff]  ;;  %v512_v58 = vld [vmem:[%s4373_s2 + $0x10] sm:$0xff] (!%p2353_p8)  ;;  %v530_v60 = vld [vmem:[%s4373_s2 + $0xa0] sm:$0xff] (!%p2353_p8)  ;;  %704 = vperm.xlu1 (!%p2353_p8), %3264, %v3864_v35  }
  0xa8   : > { %v513_v59 = vld [vmem:[%s4373_s2 + $0x18] sm:$0xff]  ;;  %v531_v61 = vld [vmem:[%s4373_s2 + $0xa8] sm:$0xff]  ;;  %v514_v48 = vld [vmem:[%s4373_s2 + $0x20] sm:$0xff] }
  0xa9   : > { %v2938_v62 = vpack.c.bf16 %v513_v59, %v512_v58  ;;  %v2940_v63 = vpack.c.bf16 %v531_v61, %v530_v60  ;;  %v515_v49 = vld [vmem:[%s4373_s2 + $0x28] sm:$0xff]  ;;  %v532_v50 = vld [vmem:[%s4373_s2 + $0xb0] sm:$0xff]  ;;  %v533_v51 = vld [vmem:[%s4373_s2 + $0xb8] sm:$0xff] }
  0xaa   : > { %v2942_v52 = vpack.c.bf16 %v515_v49, %v514_v48  ;;  %v2944_v53 = vpack.c.bf16 %v533_v51, %v532_v50  ;;  %v516_v54 = vld [vmem:[%s4373_s2 + $0x30] sm:$0xff]  ;;  %v517_v55 = vld [vmem:[%s4373_s2 + $0x38] sm:$0xff]  ;;  %v534_v56 = vld [vmem:[%s4373_s2 + $0xc0] sm:$0xff]  ;;  %709 = vperm.xlu0 %3263, %v3866_v36  }
  0xab   : > { %2939 = vmatpush3.bf16.msra.mxu0 %v2938_v62  ;;  %3137 = vmatpush3.bf16.msra.mxu1 %v2938_v62  ;;  %v535_v57 = vld [vmem:[%s4373_s2 + $0xc8] sm:$0xff]  ;;  %v2946_v58 = vpack.c.bf16 %v517_v55, %v516_v54  ;;  %v518_v60 = vld [vmem:[%s4373_s2 + $0x40] sm:$0xff]  ;;  %v536_v62 = vld [vmem:[%s4373_s2 + $0xd0] sm:$0xff] }
  0xac   : > { %2941 = vmatprep.subr.bf16.mxu0 %v2940_v63  ;;  %3130 = vmatprep.subr.bf16.mxu1 %v2940_v63  ;;  %v2948_v59 = vpack.c.bf16 %v535_v57, %v534_v56  ;;  %v519_v61 = vld [vmem:[%s4373_s2 + $0x48] sm:$0xff]  ;;  %v537_v63 = vld [vmem:[%s4373_s2 + $0xd8] sm:$0xff]  ;;  %v520_v50 = vld [vmem:[%s4373_s2 + $0x50] sm:$0xff] }
  0xad   : > { %714 = vperm.xlu1 %3264, %v3868_v37   ;;  %v2950_v48 = vpack.c.bf16 %v519_v61, %v518_v60  ;;  %v2952_v49 = vpack.c.bf16 %v537_v63, %v536_v62  ;;  %v521_v51 = vld [vmem:[%s4373_s2 + $0x58] sm:$0xff]  ;;  %v522_v56 = vld [vmem:[%s4373_s2 + $0x60] sm:$0xff]  ;;  %v523_v57 = vld [vmem:[%s4373_s2 + $0x68] sm:$0xff] }
  0xae   : > { %719 = vperm.xlu0 %3263, %v3870_v38   ;;  %v2954_v54 = vpack.c.bf16 %v521_v51, %v520_v50  ;;  %v2958_v60 = vpack.c.bf16 %v523_v57, %v522_v56  ;;  %v524_v62 = vld [vmem:[%s4373_s2 + $0x70] sm:$0xff]  ;;  %v525_v63 = vld [vmem:[%s4373_s2 + $0x78] sm:$0xff]  ;;  %v784_v50 = vld [vmem:[#allocation5 + $0x8] sm:$0xff] }
  0xaf   : > { %2943 = vmatpush3.bf16.msra.mxu0 %v2942_v52  ;;  %3138 = vmatpush3.bf16.msra.mxu1 %v2942_v52  ;;  %v538_v52 = vld [vmem:[%s4373_s2 + $0xe0] sm:$0xff] }
  0xb0   : > { %2945 = vmatprep.subr.bf16.mxu0 %v2944_v53  ;;  %3131 = vmatprep.subr.bf16.mxu1 %v2944_v53  ;;  %v539_v53 = vld [vmem:[%s4373_s2 + $0xe8] sm:$0xff] }
  0xb1   : > { %724 = vperm.xlu1 %3264, %v3872_v39   ;;  %v2956_v55 = vpack.c.bf16 %v539_v53, %v538_v52 }
  0xb2   : > { %729 = vperm.xlu0 %3263, %v3874_v40  }
  0xb3   : > { %2947 = vmatpush3.bf16.msra.mxu0 %v2946_v58  ;;  %3139 = vmatpush3.bf16.msra.mxu1 %v2946_v58  ;;  %v540_v58 = vld [vmem:[%s4373_s2 + $0xf0] sm:$0xff] }
  0xb4   : > { %2949 = vmatprep.subr.bf16.mxu0 %v2948_v59  ;;  %3132 = vmatprep.subr.bf16.mxu1 %v2948_v59  ;;  %v541_v59 = vld [vmem:[%s4373_s2 + $0xf8] sm:$0xff] }
  0xb5   : > { %734 = vperm.xlu1 %3264, %v3876_v41   ;;  %v2960_v61 = vpack.c.bf16 %v541_v59, %v540_v58 }
  0xb6   : > { %739 = vperm.xlu0 %3263, %v3878_v42  }
  0xb7   : > { %2951 = vmatpush3.bf16.msra.mxu0 %v2950_v48  ;;  %3140 = vmatpush3.bf16.msra.mxu1 %v2950_v48  ;;  %v2962_v48 = vpack.c.bf16 %v525_v63, %v524_v62 }
  0xb8   : > { %2953 = vmatprep.subr.bf16.mxu0 %v2952_v49  ;;  %3133 = vmatprep.subr.bf16.mxu1 %v2952_v49  ;;  %v783_v49 = vld [vmem:[#allocation5] sm:$0xff] }
  0xb9   : > { %744 = vperm.xlu1 %3264, %v3880_v43   ;;  %v2964_v51 = vpack.c.bf16 %v784_v50, %v783_v49 }
  0xba   : > { %749 = vperm.xlu0 %3263, %v3882_v44  }
  0xbb   : > { %2955 = vmatpush3.bf16.msra.mxu0 %v2954_v54  ;;  %3141 = vmatpush3.bf16.msra.mxu1 %v2954_v54 }
  0xbc   : > { %2957 = vmatprep.subr.bf16.mxu0 %v2956_v55  ;;  %3134 = vmatprep.subr.bf16.mxu1 %v2956_v55 }
  0xbd   : > { %754 = vperm.xlu1 %3264, %v3884_v45  }
  0xbe   : > { %759 = vperm.xlu0 %3263, %v3886_v46  }
  0xbf   : > { %2959 = vmatpush3.bf16.msra.mxu0 %v2958_v60  ;;  %3142 = vmatpush3.bf16.msra.mxu1 %v2958_v60 }
  0xc0   : > { %2961 = vmatprep.subr.bf16.mxu0 %v2960_v61  ;;  %3135 = vmatprep.subr.bf16.mxu1 %v2960_v61 }
  0xc1   : > { %764 = vperm.xlu1 %3264, %v3888_v47  }
  0xc3   : > { %2963 = vmatpush3.bf16.msra.mxu0 %v2962_v48  ;;  %3143 = vmatpush3.bf16.msra.mxu1 %v2962_v48 }
  0xc4   : > { %2965 = vmatprep.subr.bf16.mxu1 %v2964_v51 }
  0xc6   : > { %607 = vmatmul.mubr.f32.vlgmr.msra.gmra.mrb[0].mxu0 %v3760_v0  ;;  %667 = vmatmul.mubr.f32.vlgmr.msra.gmra.mrb[0].mxu1 %v3835_v24 }
  0xc7   : > { %611 = vmatprep.mubr.f32.mxu0 %v3769_v3  ;;  %671 = vmatprep.mubr.f32.mxu1 %v3844_v27 }
  0xc8   : > { %2967 = vmatpush3.bf16.msra.mxu1 %v2964_v51 }
  0xca   : > { %612 = vmatmul.mubr.f32.gmra.mrb[2].mxu0 %v3766_v2  ;;  %672 = vmatmul.mubr.f32.gmra.mrb[2].mxu1 %v3841_v26 }
  0xcb   : > { %616 = vmatprep.mubr.f32.mxu0 %v3775_v5  ;;  %676 = vmatprep.mubr.f32.mxu1 %v3850_v29 }
  0xce   : > { %617 = vmatmul.mubr.f32.gmra.mrb[4].mxu0 %v3772_v4  ;;  %677 = vmatmul.mubr.f32.gmra.mrb[4].mxu1 %v3847_v28 }
  0xcf   : > { %621 = vmatprep.mubr.f32.mxu0 %v3781_v7  ;;  %681 = vmatprep.mubr.f32.mxu1 %v3856_v31 }
  0xd2   : > { %622 = vmatmul.mubr.f32.gmra.mrb[6].mxu0 %v3778_v6  ;;  %682 = vmatmul.mubr.f32.gmra.mrb[6].mxu1 %v3853_v30 }
  0xd3   : > { %626 = vmatprep.mubr.f32.mxu0 %v3787_v9 }
  0xd6   : > { %627 = vmatmul.mubr.f32.gmra.mrb[8].mxu0 %v3784_v8 }
  0xd7   : > { %631 = vmatprep.mubr.f32.mxu0 %v3793_v11 }
  0xda   : > { %632 = vmatmul.mubr.f32.gmra.mrb[10].mxu0 %v3790_v10 }
  0xdb   : > { %636 = vmatprep.mubr.f32.mxu0 %v3799_v13 }
  0xde   : > { %637 = vmatmul.mubr.f32.gmra.mrb[12].mxu0 %v3796_v12 }
  0xdf   : > { %641 = vmatprep.mubr.f32.mxu0 %v3805_v15 }
  0xe2   : > { %642 = vmatmul.mubr.f32.gmra.mrb[14].mxu0 %v3802_v14 }
  0xe3   : > { %646 = vmatprep.mubr.f32.mxu0 %v3811_v17 }
  0xe6   : > { %647 = vmatmul.mubr.f32.gmra.mrb[16].mxu0 %v3808_v16 }
  0xe7   : > { %651 = vmatprep.mubr.f32.mxu0 %v3817_v19 }
  0xea   : > { %652 = vmatmul.mubr.f32.gmra.mrb[18].mxu0 %v3814_v18 }
  0xeb   : > { %656 = vmatprep.mubr.f32.mxu0 %v3826_v21 }
  0xee   : > { %657 = vmatmul.mubr.f32.gmra.mrb[20].mxu0 %v3820_v20 }
  0xef   : > { %661 = vmatprep.mubr.f32.mxu0 %v3832_v23 }
  0xf2   : > { %662 = vmatmul.mubr.f32.gmra.mrb[22].mxu0 %v3829_v22 }
 0x121   : > { %v690_v52 = vpop.permute.xlu0 %689 }
 0x122   : > { %v700_v50 = vpop.permute.xlu1 %699 }
 0x125   : > { %v695_v51 = vpop.permute.xlu0 %694 }
 0x199   : > { %v2414_v53 = vpop.f32.mrb[0].mxu0  ;;  %v2450_v54 = vpop.f32.mrb[0].mxu1 }
 0x19a   : > { %v2415_v55 = vpop.f32.mrb[1].mxu0  ;;  %v2451_v56 = vpop.f32.mrb[1].mxu1 }
 0x19b   : > { %v2416_v57 = vadd.f32 %v2415_v55, %v2414_v53  ;;  %v4038_v58 = vadd.f32 %v2451_v56, %v2450_v54 }
 0x19d   : > { %v767_v59 = vmul.f32 %v2416_v57, %v690_v52  ;;  %v2417_v60 = vpop.f32.mrb[2].mxu0  ;;  %v2453_v61 = vpop.f32.mrb[2].mxu1 }
 0x19e   : > { %v2418_v62 = vpop.f32.mrb[3].mxu0  ;;  %v2454_v63 = vpop.f32.mrb[3].mxu1 }
 0x19f   : > { %v2419_v48 = vadd.f32 %v2418_v62, %v2417_v60  ;;  %2740 = vmatprep.mubr.msk.f32.mxu1 %vm792_vm0, %v767_v59  ;;  %v4041_v49 = vadd.f32 %v2454_v63, %v2453_v61  ;;  %v705_v63 = vpop.permute.xlu1 %704 }
 0x1a1   : > { %v768_v30 = vmul.f32 %v2419_v48, %v695_v51  ;;  %v2420_v31 = vpop.f32.mrb[4].mxu0  ;;  %v2456_v28 = vpop.f32.mrb[4].mxu1 }
 0x1a2   : > { %v2421_v29 = vpop.f32.mrb[5].mxu0  ;;  %v2457_v53 = vpop.f32.mrb[5].mxu1 }
 0x1a3   : > { %v2422_v54 = vadd.f32 %v2421_v29, %v2420_v31  ;;  %2741 = vmatmul.mubr.msk.f32.vlgmr.msra.gmra.mrb[8].mxu1 %vm792_vm0, %v768_v30  ;;  %v4044_v52 = vadd.f32 %v2457_v53, %v2456_v28  ;;  %v710_v29 = vpop.permute.xlu0 %709  ;;  %v715_v53 = vpop.permute.xlu1 %714 }
 0x1a5   : > { %v769_v55 = vmul.f32 %v2422_v54, %v700_v50  ;;  %v2423_v56 = vpop.f32.mrb[6].mxu0  ;;  %v2459_v57 = vpop.f32.mrb[6].mxu1 }
 0x1a6   : > { %v2424_v60 = vpop.f32.mrb[7].mxu0  ;;  %v2460_v62 = vpop.f32.mrb[7].mxu1 }
 0x1a7   : > { %v2425_v59 = vadd.f32 %v2424_v60, %v2423_v56  ;;  %2743 = vmatprep.mubr.msk.f32.mxu1 %vm792_vm0, %v769_v55  ;;  %v2461_v61 = vadd.f32 %v2460_v62, %v2459_v57  ;;  %v720_v55 = vpop.permute.xlu0 %719 }
 0x1a9   : > { %v770_v48 = vmul.f32 %v2425_v59, %v705_v63  ;;  %v2426_v51 = vpop.f32.mrb[8].mxu0 }
 0x1aa   : > { %v2427_v26 = vpop.f32.mrb[9].mxu0 }
 0x1ab   : > { %v2428_v27 = vadd.f32 %v2427_v26, %v2426_v51  ;;  %2744 = vmatmul.mubr.msk.f32.gmra.mrb[10].mxu1 %vm792_vm0, %v770_v48  ;;  %v725_v26 = vpop.permute.xlu1 %724 }
 0x1ad   : > { %v771_v30 = vmul.f32 %v2428_v27, %v710_v29  ;;  %v2429_v28 = vpop.f32.mrb[10].mxu0  ;;  %v730_v27 = vpop.permute.xlu0 %729 }
 0x1ae   : > { %v2430_v31 = vpop.f32.mrb[11].mxu0 }
 0x1af   : > { %v2431_v50 = vadd.f32 %v2430_v31, %v2429_v28  ;;  %2746 = vmatprep.mubr.msk.f32.mxu1 %vm792_vm0, %v771_v30  ;;  %v735_v31 = vpop.permute.xlu1 %734 }
 0x1b1   : > { %v772_v54 = vmul.f32 %v2431_v50, %v715_v53  ;;  %v2432_v56 = vpop.f32.mrb[12].mxu0 }
 0x1b2   : > { %v2433_v60 = vpop.f32.mrb[13].mxu0 }
 0x1b3   : > { %v2434_v57 = vadd.f32 %v2433_v60, %v2432_v56  ;;  %2747 = vmatmul.mubr.msk.f32.gmra.mrb[12].mxu1 %vm792_vm0, %v772_v54  ;;  %v740_v60 = vpop.permute.xlu0 %739 }
 0x1b5   : > { %v773_v62 = vmul.f32 %v2434_v57, %v720_v55  ;;  %v2435_v59 = vpop.f32.mrb[14].mxu0 }
 0x1b6   : > { %v2436_v63 = vpop.f32.mrb[15].mxu0 }
 0x1b7   : > { %v2437_v48 = vadd.f32 %v2436_v63, %v2435_v59  ;;  %2749 = vmatprep.mubr.msk.f32.mxu1 %vm792_vm0, %v773_v62  ;;  %v745_v59 = vpop.permute.xlu1 %744 }
 0x1b9   : > { %v774_v51 = vmul.f32 %v2437_v48, %v725_v26  ;;  %v2438_v29 = vpop.f32.mrb[16].mxu0  ;;  %v750_v26 = vpop.permute.xlu0 %749 }
 0x1ba   : > { %v2439_v28 = vpop.f32.mrb[17].mxu0 }
 0x1bb   : > { %v2440_v30 = vadd.f32 %v2439_v28, %v2438_v29  ;;  %2750 = vmatmul.mubr.msk.f32.gmra.mrb[14].mxu1 %vm792_vm0, %v774_v51 }
 0x1bd   : > { %v775_v50 = vmul.f32 %v2440_v30, %v730_v27  ;;  %v2441_v53 = vpop.f32.mrb[18].mxu0  ;;  %v755_v27 = vpop.permute.xlu1 %754 }
 0x1be   : > { %v2442_v56 = vpop.f32.mrb[19].mxu0 }
 0x1bf   : > { %v2443_v54 = vadd.f32 %v2442_v56, %v2441_v53  ;;  %2752 = vmatprep.mubr.msk.f32.mxu1 %vm792_vm0, %v775_v50  ;;  %v779_v53 = vmul.f32 %v4038_v58, %v750_v26  ;;  %v760_v56 = vpop.permute.xlu0 %759  ;;  %v2354_v58 = vld [vmem:[%s4376_s5] ss:$0 sm:$0xff] }
 0x1c0   : > { %v781_v50 = vmul.f32 %v4044_v52, %v760_v56 }
 0x1c1   : > { %v776_v55 = vmul.f32 %v2443_v54, %v735_v31  ;;  %v2444_v57 = vpop.f32.mrb[20].mxu0  ;;  %v780_v31 = vmul.f32 %v4041_v49, %v755_v27 }
 0x1c2   : > { %v2445_v63 = vpop.f32.mrb[21].mxu0 }
 0x1c3   : > { %v2446_v62 = vadd.f32 %v2445_v63, %v2444_v57  ;;  %2753 = vmatmul.mubr.msk.f32.gmra.mrb[16].mxu1 %vm792_vm0, %v776_v55 }
 0x1c5   : > { %v777_v48 = vmul.f32 %v2446_v62, %v740_v60  ;;  %v2447_v29 = vpop.f32.mrb[22].mxu0  ;;  %v765_v60 = vpop.permute.xlu1 %764 }
 0x1c6   : > { %v2448_v28 = vpop.f32.mrb[23].mxu0  ;;  %v782_v54 = vmul.f32 %v2461_v61, %v765_v60 }
 0x1c7   : > { %v2449_v51 = vadd.f32 %v2448_v28, %v2447_v29  ;;  %2755 = vmatprep.mubr.msk.f32.mxu1 %vm792_vm0, %v777_v48 }
 0x1c9   : > { %v778_v30 = vmul.f32 %v2449_v51, %v745_v59 }
 0x1cb   : > { %2756 = vmatmul.mubr.msk.f32.gmra.mrb[18].mxu1 %vm792_vm0, %v778_v30 }
 0x1cc   : > { %2758 = vmatprep.mubr.msk.f32.mxu1 %vm792_vm0, %v779_v53 }
 0x1cf   : > { %2759 = vmatmul.mubr.msk.f32.gmra.mrb[20].mxu1 %vm792_vm0, %v780_v31 }
 0x1d0   : > { %2761 = vmatprep.mubr.msk.f32.mxu1 %vm792_vm0, %v781_v50 }
 0x1d3   : > { %2762 = vmatmul.mubr.msk.f32.gmra.mrb[22].mxu1 %vm792_vm0, %v782_v54 }
 0x276   : > { %v2742_v55 = vpop.f32.mrb[8].mxu1 }
 0x277   : > { %v913_v57 = vadd.f32 %v2742_v55, %v2354_v58  ;;  %v907_v59 = vpop.f32.mrb[9].mxu1 }
 0x278   : > { %v908_v63 = vadd.f32 %v2354_v58, %v907_v59 }
 0x279   : > { %v987_v62 = vmax.f32 %v913_v57, 0.0 }
 0x27a   : > { %v986_v49 = vmax.f32 %v908_v63, 0.0 }
 0x27b   : > { %1004 = vst [vmem:[%s4067_s15 + $0x8] sm:$0xff] %v987_v62 }
 0x27c   : > { %1003 = vst [vmem:[%s4067_s15] sm:$0xff] %v986_v49 }
 0x27e   : > { %v2745_v52 = vpop.f32.mrb[10].mxu1 }
 0x27f   : > { %v923_v61 = vadd.f32 %v2745_v52, %v2354_v58  ;;  %v917_v26 = vpop.f32.mrb[11].mxu1 }
 0x280   : > { %v918_v48 = vadd.f32 %v2354_v58, %v917_v26 }
 0x281   : > { %v989_v29 = vmax.f32 %v923_v61, 0.0 }
 0x282   : > { %v988_v28 = vmax.f32 %v918_v48, 0.0 }
 0x283   : > { %1006 = vst [vmem:[%s4067_s15 + $0x18] sm:$0xff] %v989_v29 }
 0x284   : > { %1005 = vst [vmem:[%s4067_s15 + $0x10] sm:$0xff] %v988_v28 }
 0x286   : > { %v2748_v51 = vpop.f32.mrb[12].mxu1 }
 0x287   : > { %v933_v27 = vadd.f32 %v2748_v51, %v2354_v58  ;;  %v927_v30 = vpop.f32.mrb[13].mxu1 }
 0x288   : > { %v928_v53 = vadd.f32 %v2354_v58, %v927_v30 }
 0x289   : > { %v991_v56 = vmax.f32 %v933_v27, 0.0 }
 0x28a   : > { %v990_v31 = vmax.f32 %v928_v53, 0.0 }
 0x28b   : > { %1008 = vst [vmem:[%s4067_s15 + $0x28] sm:$0xff] %v991_v56 }
 0x28c   : > { %1007 = vst [vmem:[%s4067_s15 + $0x20] sm:$0xff] %v990_v31 }
 0x28e   : > { %v2751_v50 = vpop.f32.mrb[14].mxu1 }
 0x28f   : > { %v943_v60 = vadd.f32 %v2751_v50, %v2354_v58  ;;  %v937_v54 = vpop.f32.mrb[15].mxu1 }
 0x290   : > { %v938_v55 = vadd.f32 %v2354_v58, %v937_v54 }
 0x291   : > { %v993_v57 = vmax.f32 %v943_v60, 0.0 }
 0x292   : > { %v992_v59 = vmax.f32 %v938_v55, 0.0 }
 0x293   : > { %1010 = vst [vmem:[%s4067_s15 + $0x38] sm:$0xff] %v993_v57 }
 0x294   : > { %1009 = vst [vmem:[%s4067_s15 + $0x30] sm:$0xff] %v992_v59 }
 0x296   : > { %v2754_v63 = vpop.f32.mrb[16].mxu1 }
 0x297   : > { %v953_v62 = vadd.f32 %v2754_v63, %v2354_v58  ;;  %v947_v49 = vpop.f32.mrb[17].mxu1 }
 0x298   : > { %v948_v52 = vadd.f32 %v2354_v58, %v947_v49 }
 0x299   : > { %v995_v61 = vmax.f32 %v953_v62, 0.0 }
 0x29a   : > { %v994_v26 = vmax.f32 %v948_v52, 0.0 }
 0x29b   : > { %1012 = vst [vmem:[%s4067_s15 + $0x48] sm:$0xff] %v995_v61 }
 0x29c   : > { %1011 = vst [vmem:[%s4067_s15 + $0x40] sm:$0xff] %v994_v26 }
 0x29e   : > { %v2757_v48 = vpop.f32.mrb[18].mxu1 }
 0x29f   : > { %v963_v29 = vadd.f32 %v2757_v48, %v2354_v58  ;;  %v957_v28 = vpop.f32.mrb[19].mxu1 }
 0x2a0   : > { %v958_v51 = vadd.f32 %v2354_v58, %v957_v28 }
 0x2a1   : > { %v997_v27 = vmax.f32 %v963_v29, 0.0 }
 0x2a2   : > { %v996_v30 = vmax.f32 %v958_v51, 0.0  ;;  %v2760_v53 = vpop.f32.mrb[20].mxu1 }
 0x2a3   : > { %1014 = vst [vmem:[%s4067_s15 + $0x58] sm:$0xff] %v997_v27  ;;  %v973_v56 = vadd.f32 %v2760_v53, %v2354_v58  ;;  %v967_v31 = vpop.f32.mrb[21].mxu1 }
 0x2a4   : > { %1013 = vst [vmem:[%s4067_s15 + $0x50] sm:$0xff] %v996_v30  ;;  %v968_v50 = vadd.f32 %v2354_v58, %v967_v31 }
 0x2a5   : > { %v999_v60 = vmax.f32 %v973_v56, 0.0 }
 0x2a6   : > { %v998_v54 = vmax.f32 %v968_v50, 0.0  ;;  %v2763_v55 = vpop.f32.mrb[22].mxu1 }
 0x2a7   : > { %1016 = vst [vmem:[%s4067_s15 + $0x68] sm:$0xff] %v999_v60  ;;  %v983_v57 = vadd.f32 %v2763_v55, %v2354_v58  ;;  %v977_v59 = vpop.f32.mrb[23].mxu1 }
 0x2a8   : > { %1015 = vst [vmem:[%s4067_s15 + $0x60] sm:$0xff] %v998_v54  ;;  %v978_v63 = vadd.f32 %v2354_v58, %v977_v59 }
 0x2a9   : > { %v1001_v62 = vmax.f32 %v983_v57, 0.0 }
 0x2aa   : > { %v1000_v49 = vmax.f32 %v978_v63, 0.0 }
 0x2ab   : > { %1018 = vst [vmem:[%s4067_s15 + $0x78] sm:$0xff] %v1001_v62 }
 0x2ac   : > { %1017 = vst [vmem:[%s4067_s15 + $0x70] sm:$0xff] %v1000_v49 }
 0x2ad PF: > { %p2371_p11 = scmp.ne.s32.totalorder %s3475_s17, 1 }
 0x2ae   : > { %1119 = vmatprep.mubr.f32.mxu0 (!%p2371_p11), %v3763_v1  ;;  %v3496_v27 = vmov (!%p2371_p11), 0   ;;  %s4163_s10 = scalar_lea.vmem (!%p2371_p11), [#allocation4], %s3752_s18  ;;  %s4185_s11 = scalar_lea.vmem (!%p2371_p11), [#allocation3], %s3752_s18 }
 0x2af   : > { %1022 = sbr.rel (%p2371_p11) target bundleno = 1253 (0x4e5), region = 84  ;;  %3265 = vset.pattern.permute.xlu0 (!%p2371_p11), %v3496_v27  ;;  %3266 = vset.pattern.permute.xlu1 (!%p2371_p11), %v3496_v27  ;;  %v1299_v27 = vld [vmem:[#allocation10 + $0x18] sm:$0xff] (!%p2371_p11) }
 0x2b0   : > { %1202 = vperm.xlu0 (!%p2371_p11), %3265, %v3858_v32   ;;  %1212 = vperm.xlu1 (!%p2371_p11), %3266, %v3862_v34  }
 0x2b3   : > { %v1039_v52 = vld [vmem:[#allocation2 + $0x80] sm:$0xff] (!%p2371_p11)  ;;  %v1040_v61 = vld [vmem:[#allocation2 + $0x88] sm:$0xff] (!%p2371_p11)  ;;  %v1041_v28 = vld [vmem:[#allocation2 + $0x90] sm:$0xff] (!%p2371_p11) }
 0x2b4   : > { %v1023_v26 = vld [vmem:[#allocation2] sm:$0xff] (!%p2371_p11)  ;;  %v2968_v48 = vpack.c.bf16 (!%p2371_p11), %v1040_v61, %v1039_v52  ;;  %v1024_v29 = vld [vmem:[#allocation2 + $0x8] sm:$0xff] (!%p2371_p11)  ;;  %v1042_v51 = vld [vmem:[#allocation2 + $0x98] sm:$0xff] (!%p2371_p11)  ;;  %1207 = vperm.xlu0 (!%p2371_p11), %3265, %v3860_v33   ;;  %1217 = vperm.xlu1 (!%p2371_p11), %3266, %v3864_v35  }
 0x2b5   : > { %v2970_v58 = vpack.c.bf16 (!%p2371_p11), %v1024_v29, %v1023_v26  ;;  %v2972_v30 = vpack.c.bf16 (!%p2371_p11), %v1042_v51, %v1041_v28  ;;  %v1025_v53 = vld [vmem:[#allocation2 + $0x10] sm:$0xff] (!%p2371_p11)  ;;  %v1026_v56 = vld [vmem:[#allocation2 + $0x18] sm:$0xff] (!%p2371_p11)  ;;  %v1043_v31 = vld [vmem:[#allocation2 + $0xa0] sm:$0xff] (!%p2371_p11) }
 0x2b6   : > { %2969 = vmatprep.subr.bf16.mxu0 %v2968_v48  ;;  %v1044_v50 = vld [vmem:[#allocation2 + $0xa8] sm:$0xff]  ;;  %v2974_v60 = vpack.c.bf16 %v1026_v56, %v1025_v53  ;;  %v1027_v55 = vld [vmem:[#allocation2 + $0x20] sm:$0xff]  ;;  %v1045_v59 = vld [vmem:[#allocation2 + $0xb0] sm:$0xff] }
 0x2b7   : > { %2971 = vmatpush3.bf16.msra.mxu0 %v2970_v58  ;;  %v2976_v54 = vpack.c.bf16 %v1044_v50, %v1043_v31  ;;  %v1028_v57 = vld [vmem:[#allocation2 + $0x28] sm:$0xff]  ;;  %v1046_v63 = vld [vmem:[#allocation2 + $0xb8] sm:$0xff]  ;;  %v1029_v52 = vld [vmem:[#allocation2 + $0x30] sm:$0xff] }
 0x2b8   : > { %2973 = vmatprep.subr.bf16.mxu0 %v2972_v30  ;;  %v2978_v62 = vpack.c.bf16 %v1028_v57, %v1027_v55  ;;  %v2980_v49 = vpack.c.bf16 %v1046_v63, %v1045_v59  ;;  %v1030_v61 = vld [vmem:[#allocation2 + $0x38] sm:$0xff]  ;;  %v1047_v26 = vld [vmem:[#allocation2 + $0xc0] sm:$0xff]  ;;  %v1048_v48 = vld [vmem:[#allocation2 + $0xc8] sm:$0xff]  ;;  %1222 = vperm.xlu0 %3265, %v3866_v36  }
 0x2b9   : > { %1227 = vperm.xlu1 %3266, %v3868_v37   ;;  %v1296_v29 = vld [vmem:[#allocation10] sm:$0xff]  ;;  %v1297_v28 = vld [vmem:[#allocation10 + $0x8] sm:$0xff]  ;;  %v1298_v51 = vld [vmem:[#allocation10 + $0x10] sm:$0xff]  ;;  %v2982_v58 = vpack.c.bf16 %v1030_v61, %v1029_v52  ;;  %v2984_v53 = vpack.c.bf16 %v1048_v48, %v1047_v26 }
 0x2ba   : > { %v3000_v30 = vpack.c.bf16 %v1297_v28, %v1296_v29  ;;  %v1031_v56 = vld [vmem:[#allocation2 + $0x40] sm:$0xff]  ;;  %v1032_v31 = vld [vmem:[#allocation2 + $0x48] sm:$0xff]  ;;  %v1049_v50 = vld [vmem:[#allocation2 + $0xd0] sm:$0xff] }
 0x2bb   : > { %2975 = vmatpush3.bf16.msra.mxu0 %v2974_v60  ;;  %v3004_v60 = vpack.c.bf16 %v1299_v27, %v1298_v51  ;;  %v1300_v55 = vld [vmem:[#allocation10 + $0x20] sm:$0xff]  ;;  %v1301_v57 = vld [vmem:[#allocation10 + $0x28] sm:$0xff]  ;;  %v2986_v59 = vpack.c.bf16 %v1032_v31, %v1031_v56  ;;  %v1051_v52 = vld [vmem:[#allocation2 + $0xe0] sm:$0xff] }
 0x2bc   : > { %2977 = vmatprep.subr.bf16.mxu0 %v2976_v54  ;;  %v1050_v54 = vld [vmem:[#allocation2 + $0xd8] sm:$0xff]  ;;  %1232 = vperm.xlu0 %3265, %v3870_v38   ;;  %v3008_v61 = vpack.c.bf16 %v1301_v57, %v1300_v55  ;;  %v1052_v26 = vld [vmem:[#allocation2 + $0xe8] sm:$0xff]  ;;  %v1302_v48 = vld [vmem:[#allocation10 + $0x30] sm:$0xff] }
 0x2bd   : > { %1237 = vperm.xlu1 %3266, %v3872_v39   ;;  %3001 = vmatprep.subr.bf16.mxu1 %v3000_v30  ;;  %v2988_v63 = vpack.c.bf16 %v1050_v54, %v1049_v50  ;;  %v1303_v29 = vld [vmem:[#allocation10 + $0x38] sm:$0xff]  ;;  %v2992_v51 = vpack.c.bf16 %v1052_v26, %v1051_v52  ;;  %v1035_v27 = vld [vmem:[#allocation2 + $0x60] sm:$0xff]  ;;  %v1054_v56 = vld [vmem:[#allocation2 + $0xf8] sm:$0xff] }
 0x2be   : > { %3003 = vmatpush3.bf16.msra.mxu1 %v3000_v30  ;;  %v1053_v30 = vld [vmem:[#allocation2 + $0xf0] sm:$0xff]  ;;  %v1305_v50 = vld [vmem:[#allocation10 + $0x48] sm:$0xff] }
 0x2bf   : > { %2979 = vmatpush3.bf16.msra.mxu0 %v2978_v62  ;;  %v1033_v62 = vld [vmem:[#allocation2 + $0x50] sm:$0xff]  ;;  %3005 = vmatprep.subr.bf16.mxu1 %v3004_v60  ;;  %v2996_v55 = vpack.c.bf16 %v1054_v56, %v1053_v30  ;;  %v1038_v57 = vld [vmem:[#allocation2 + $0x78] sm:$0xff]  ;;  %v1311_v56 = vld [vmem:[#allocation10 + $0x78] sm:$0xff] }
 0x2c0   : > { %2981 = vmatprep.subr.bf16.mxu0 %v2980_v49  ;;  %v1034_v49 = vld [vmem:[#allocation2 + $0x58] sm:$0xff]  ;;  %1242 = vperm.xlu0 %3265, %v3874_v40   ;;  %v1304_v31 = vld [vmem:[#allocation10 + $0x40] sm:$0xff] }
 0x2c1   : > { %1247 = vperm.xlu1 %3266, %v3876_v41   ;;  %v2990_v28 = vpack.c.bf16 %v1034_v49, %v1033_v62  ;;  %v1307_v62 = vld [vmem:[#allocation10 + $0x58] sm:$0xff]  ;;  %v4447_v26 = vld [vmem:[#allocation36_spill] sm:$0xff] }
 0x2c2   : > { %3007 = vmatpush3.bf16.msra.mxu1 %v3004_v60  ;;  %v1037_v60 = vld [vmem:[#allocation2 + $0x70] sm:$0xff] }
 0x2c3   : > { %2983 = vmatpush3.bf16.msra.mxu0 %v2982_v58  ;;  %v1036_v58 = vld [vmem:[#allocation2 + $0x68] sm:$0xff]  ;;  %3009 = vmatprep.subr.bf16.mxu1 %v3008_v61  ;;  %v2998_v49 = vpack.c.bf16 %v1038_v57, %v1037_v60 }
 0x2c4   : > { %2985 = vmatprep.subr.bf16.mxu0 %v2984_v53  ;;  %v3012_v53 = vpack.c.bf16 %v1303_v29, %v1302_v48  ;;  %1252 = vperm.xlu0 %3265, %v3878_v42   ;;  %v2994_v54 = vpack.c.bf16 %v1036_v58, %v1035_v27  ;;  %v4448_v48 = vld [vmem:[#allocation39_spill] sm:$0xff]  ;;  %v4449_v29 = vld [vmem:[#allocation38_spill] sm:$0xff]  ;;  %v1308_v27 = vld [vmem:[#allocation10 + $0x60] sm:$0xff] }
 0x2c5   : > { %1257 = vperm.xlu1 %3266, %v3880_v43   ;;  %v1309_v58 = vld [vmem:[#allocation10 + $0x68] sm:$0xff] }
 0x2c6   : > { %3011 = vmatpush3.bf16.msra.mxu1 %v3008_v61  ;;  %v4446_v61 = vld [vmem:[#allocation37_spill] sm:$0xff]  ;;  %v3024_v30 = vpack.c.bf16 %v1309_v58, %v1308_v27 }
 0x2c7   : > { %2987 = vmatpush3.bf16.msra.mxu0 %v2986_v59  ;;  %3013 = vmatprep.subr.bf16.mxu1 %v3012_v53  ;;  %v3016_v59 = vpack.c.bf16 %v1305_v50, %v1304_v31  ;;  %v1474_v50 = vld [vmem:[#allocation8] sm:$0xff] }
 0x2c8   : > { %2989 = vmatprep.subr.bf16.mxu0 %v2988_v63  ;;  %1262 = vperm.xlu0 %3265, %v3882_v44   ;;  %v1306_v63 = vld [vmem:[#allocation10 + $0x50] sm:$0xff] }
 0x2c9   : > { %1267 = vperm.xlu1 %3266, %v3884_v45   ;;  %v3020_v52 = vpack.c.bf16 %v1307_v62, %v1306_v63 }
 0x2ca   : > { %3015 = vmatpush3.bf16.msra.mxu1 %v3012_v53  ;;  %v1310_v53 = vld [vmem:[#allocation10 + $0x70] sm:$0xff] }
 0x2cb   : > { %2991 = vmatpush3.bf16.msra.mxu0 %v2990_v28  ;;  %3017 = vmatprep.subr.bf16.mxu1 %v3016_v59  ;;  %v4450_v28 = vld [vmem:[#allocation41_spill] sm:$0xff]  ;;  %v3028_v31 = vpack.c.bf16 %v1311_v56, %v1310_v53  ;;  %v1478_v53 = vld [vmem:[#allocation8 + $0x20] sm:$0xff] }
 0x2cc   : > { %2993 = vmatprep.subr.bf16.mxu0 %v2992_v51  ;;  %1272 = vperm.xlu0 %3265, %v3886_v46   ;;  %v4451_v51 = vld [vmem:[#allocation40_spill] sm:$0xff]  ;;  %v1479_v56 = vld [vmem:[#allocation8 + $0x28] sm:$0xff] }
 0x2cd   : > { %1277 = vperm.xlu1 %3266, %v3888_v47  }
 0x2ce   : > { %3019 = vmatpush3.bf16.msra.mxu1 %v3016_v59 }
 0x2cf   : > { %2995 = vmatpush3.bf16.msra.mxu0 %v2994_v54  ;;  %3021 = vmatprep.subr.bf16.mxu1 %v3020_v52  ;;  %v1475_v54 = vld [vmem:[#allocation8 + $0x8] sm:$0xff] }
 0x2d0   : > { %2997 = vmatprep.subr.bf16.mxu0 %v2996_v55  ;;  %v3032_v55 = vpack.c.bf16 %v1475_v54, %v1474_v50 }
 0x2d2   : > { %3023 = vmatpush3.bf16.msra.mxu1 %v3020_v52 }
 0x2d3   : > { %2999 = vmatpush3.bf16.msra.mxu0 %v2998_v49  ;;  %3025 = vmatprep.subr.bf16.mxu1 %v3024_v30 }
 0x2d6   : > { %1120 = vmatmul.mubr.f32.vlgmr.msra.gmra.mrb[0].mxu0 %v3760_v0  ;;  %3027 = vmatpush3.bf16.msra.mxu1 %v3024_v30 }
 0x2d7   : > { %1124 = vmatprep.mubr.f32.mxu0 %v3769_v3  ;;  %3029 = vmatprep.subr.bf16.mxu1 %v3028_v31 }
 0x2da   : > { %1125 = vmatmul.mubr.f32.gmra.mrb[2].mxu0 %v3766_v2  ;;  %3031 = vmatpush3.bf16.msra.mxu1 %v3028_v31 }
 0x2db   : > { %1129 = vmatprep.mubr.f32.mxu0 %v3775_v5  ;;  %3033 = vmatprep.subr.bf16.mxu1 %v3032_v55 }
 0x2de   : > { %1130 = vmatmul.mubr.f32.gmra.mrb[4].mxu0 %v3772_v4 }
 0x2df   : > { %1134 = vmatprep.mubr.f32.mxu0 %v3781_v7 }
 0x2e2   : > { %1135 = vmatmul.mubr.f32.gmra.mrb[6].mxu0 %v3778_v6 }
 0x2e3   : > { %1139 = vmatprep.mubr.f32.mxu0 %v3787_v9 }
 0x2e6   : > { %1140 = vmatmul.mubr.f32.gmra.mrb[8].mxu0 %v3784_v8 }
 0x2e7   : > { %1144 = vmatprep.mubr.f32.mxu0 %v3793_v11 }
 0x2ea   : > { %1145 = vmatmul.mubr.f32.gmra.mrb[10].mxu0 %v3790_v10 }
 0x2eb   : > { %1149 = vmatprep.mubr.f32.mxu0 %v3799_v13 }
 0x2ee   : > { %1150 = vmatmul.mubr.f32.gmra.mrb[12].mxu0 %v3796_v12 }
 0x2ef   : > { %1154 = vmatprep.mubr.f32.mxu0 %v3805_v15 }
 0x2f2   : > { %1155 = vmatmul.mubr.f32.gmra.mrb[14].mxu0 %v3802_v14 }
 0x2f3   : > { %1159 = vmatprep.mubr.f32.mxu0 %v3811_v17 }
 0x2f6   : > { %1160 = vmatmul.mubr.f32.gmra.mrb[16].mxu0 %v3808_v16 }
 0x2f7   : > { %1164 = vmatprep.mubr.f32.mxu0 %v3817_v19 }
 0x2fa   : > { %1165 = vmatmul.mubr.f32.gmra.mrb[18].mxu0 %v3814_v18 }
 0x2fb   : > { %1169 = vmatprep.mubr.f32.mxu0 %v3826_v21 }
 0x2fe   : > { %1170 = vmatmul.mubr.f32.gmra.mrb[20].mxu0 %v3820_v20 }
 0x2ff   : > { %1174 = vmatprep.mubr.f32.mxu0 %v3832_v23 }
 0x302   : > { %1175 = vmatmul.mubr.f32.gmra.mrb[22].mxu0 %v3829_v22 }
 0x303   : > { %1179 = vmatprep.mubr.f32.mxu0 %v3838_v25 }
 0x306   : > { %1180 = vmatmul.mubr.f32.gmra.mrb[24].mxu0 %v3835_v24 }
 0x307   : > { %1184 = vmatprep.mubr.f32.mxu0 %v4446_v61 }
 0x30a   : > { %1185 = vmatmul.mubr.f32.gmra.mrb[26].mxu0 %v4447_v26  ;;  %v1476_v26 = vld [vmem:[#allocation8 + $0x10] sm:$0xff] }
 0x30b   : > { %1189 = vmatprep.mubr.f32.mxu0 %v4448_v48  ;;  %v1477_v48 = vld [vmem:[#allocation8 + $0x18] sm:$0xff] }
 0x30c   : > { %v3036_v27 = vpack.c.bf16 %v1477_v48, %v1476_v26 }
 0x30e   : > { %1190 = vmatmul.mubr.f32.gmra.mrb[28].mxu0 %v4449_v29 }
 0x30f   : > { %1194 = vmatprep.mubr.f32.mxu0 %v4450_v28 }
 0x312   : > { %1195 = vmatmul.mubr.f32.gmra.mrb[30].mxu0 %v4451_v51 }
 0x32f   : > { %v1203_v60 = vpop.permute.xlu0 %1202  ;;  %v1213_v58 = vpop.permute.xlu1 %1212 }
 0x333   : > { %v1208_v61 = vpop.permute.xlu0 %1207 }
 0x3a9   : > { %v2512_v57 = vpop.f32.mrb[0].mxu0 }
 0x3aa   : > { %v2513_v59 = vpop.f32.mrb[1].mxu0 }
 0x3ab   : > { %v2514_v63 = vadd.f32 %v2513_v59, %v2512_v57  ;;  %v1480_v59 = vld [vmem:[#allocation8 + $0x30] sm:$0xff] }
 0x3ad   : > { %v4134_v62 = vmul.f32 %v2514_v63, %v1203_v60  ;;  %v2515_v49 = vpop.f32.mrb[2].mxu0  ;;  %v3040_v60 = vpack.c.bf16 %v1479_v56, %v1478_v53  ;;  %v1481_v63 = vld [vmem:[#allocation8 + $0x38] sm:$0xff] }
 0x3ae   : > { %v2516_v52 = vpop.f32.mrb[3].mxu0  ;;  %v3044_v48 = vpack.c.bf16 %v1481_v63, %v1480_v59 }
 0x3af   : > { %v2517_v29 = vadd.f32 %v2516_v52, %v2515_v49  ;;  %2796 = vmatprep.mubr.f32.mxu1 %v4134_v62  ;;  %v1218_v52 = vpop.permute.xlu1 %1217 }
 0x3b1   : > { %v4137_v28 = vmul.f32 %v2517_v29, %v1208_v61  ;;  %v2518_v51 = vpop.f32.mrb[4].mxu0 }
 0x3b2   : > { %v2519_v30 = vpop.f32.mrb[5].mxu0 }
 0x3b3   : > { %v2520_v31 = vadd.f32 %v2519_v30, %v2518_v51  ;;  %2797 = vmatmul.mubr.f32.vlgmr.msra.gmra.mrb[0].mxu1 %v4137_v28  ;;  %v1483_v51 = vld [vmem:[#allocation8 + $0x48] sm:$0xff]  ;;  %v1223_v30 = vpop.permute.xlu0 %1222  ;;  %v1228_v59 = vpop.permute.xlu1 %1227 }
 0x3b4   : > { %3035 = vmatpush3.bf16.msra.mxu1 %v3032_v55  ;;  %v1482_v55 = vld [vmem:[#allocation8 + $0x40] sm:$0xff] }
 0x3b5   : > { %v4140_v50 = vmul.f32 %v2520_v31, %v1213_v58  ;;  %v2521_v54 = vpop.f32.mrb[6].mxu0  ;;  %3037 = vmatprep.subr.bf16.mxu1 %v3036_v27  ;;  %v3048_v31 = vpack.c.bf16 %v1483_v51, %v1482_v55 }
 0x3b6   : > { %v2522_v57 = vpop.f32.mrb[7].mxu0 }
 0x3b7   : > { %v2523_v49 = vadd.f32 %v2522_v57, %v2521_v54  ;;  %2799 = vmatprep.mubr.f32.mxu1 %v4140_v50  ;;  %v1485_v57 = vld [vmem:[#allocation8 + $0x58] sm:$0xff]  ;;  %v1233_v55 = vpop.permute.xlu0 %1232 }
 0x3b8   : > { %3039 = vmatpush3.bf16.msra.mxu1 %v3036_v27  ;;  %v1484_v27 = vld [vmem:[#allocation8 + $0x50] sm:$0xff] }
 0x3b9   : > { %v4143_v61 = vmul.f32 %v2523_v49, %v1218_v52  ;;  %v2524_v26 = vpop.f32.mrb[8].mxu0  ;;  %3041 = vmatprep.subr.bf16.mxu1 %v3040_v60 }
 0x3ba   : > { %v2525_v29 = vpop.f32.mrb[9].mxu0 }
 0x3bb   : > { %v2526_v58 = vadd.f32 %v2525_v29, %v2524_v26  ;;  %2800 = vmatmul.mubr.f32.gmra.mrb[2].mxu1 %v4143_v61  ;;  %v3052_v26 = vpack.c.bf16 %v1485_v57, %v1484_v27  ;;  %v1238_v27 = vpop.permute.xlu1 %1237 }
 0x3bc   : > { %3043 = vmatpush3.bf16.msra.mxu1 %v3040_v60  ;;  %v1486_v60 = vld [vmem:[#allocation8 + $0x60] sm:$0xff] }
 0x3bd   : > { %v4146_v53 = vmul.f32 %v2526_v58, %v1223_v30  ;;  %v2527_v56 = vpop.f32.mrb[10].mxu0  ;;  %3045 = vmatprep.subr.bf16.mxu1 %v3044_v48  ;;  %v1487_v58 = vld [vmem:[#allocation8 + $0x68] sm:$0xff] }
 0x3be   : > { %v2528_v54 = vpop.f32.mrb[11].mxu0 }
 0x3bf   : > { %v2529_v49 = vadd.f32 %v2528_v54, %v2527_v56  ;;  %2802 = vmatprep.mubr.f32.mxu1 %v4146_v53  ;;  %v3056_v54 = vpack.c.bf16 %v1487_v58, %v1486_v60 }
 0x3c0   : > { %3047 = vmatpush3.bf16.msra.mxu1 %v3044_v48  ;;  %v1488_v48 = vld [vmem:[#allocation8 + $0x70] sm:$0xff] }
 0x3c1   : > { %v4149_v63 = vmul.f32 %v2529_v49, %v1228_v59  ;;  %v2530_v52 = vpop.f32.mrb[12].mxu0  ;;  %3049 = vmatprep.subr.bf16.mxu1 %v3048_v31  ;;  %v1489_v49 = vld [vmem:[#allocation8 + $0x78] sm:$0xff] }
 0x3c2   : > { %v2531_v29 = vpop.f32.mrb[13].mxu0 }
 0x3c3   : > { %v2532_v30 = vadd.f32 %v2531_v29, %v2530_v52  ;;  %2803 = vmatmul.mubr.f32.gmra.mrb[4].mxu1 %v4149_v63  ;;  %v3060_v52 = vpack.c.bf16 %v1489_v49, %v1488_v48 }
 0x3c4   : > { %3051 = vmatpush3.bf16.msra.mxu1 %v3048_v31  ;;  %v1243_v31 = vpop.permute.xlu0 %1242 }
 0x3c5   : > { %v4152_v51 = vmul.f32 %v2532_v30, %v1233_v55  ;;  %v2533_v56 = vpop.f32.mrb[14].mxu0  ;;  %3053 = vmatprep.subr.bf16.mxu1 %v3052_v26 }
 0x3c6   : > { %v2534_v24 = vpop.f32.mrb[15].mxu0 }
 0x3c7   : > { %v2535_v59 = vadd.f32 %v2534_v24, %v2533_v56  ;;  %2805 = vmatprep.mubr.f32.mxu1 %v4152_v51  ;;  %v1248_v24 = vpop.permute.xlu1 %1247 }
 0x3c8   : > { %3055 = vmatpush3.bf16.msra.mxu1 %v3052_v26 }
 0x3c9   : > { %v1287_v57 = vmul.f32 %v2535_v59, %v1238_v27  ;;  %v2536_v25 = vpop.f32.mrb[16].mxu0  ;;  %3057 = vmatprep.subr.bf16.mxu1 %v3056_v54  ;;  %v1253_v27 = vpop.permute.xlu0 %1252 }
 0x3ca   : > { %v2537_v29 = vpop.f32.mrb[17].mxu0 }
 0x3cb   : > { %v2538_v22 = vadd.f32 %v2537_v29, %v2536_v25  ;;  %2806 = vmatmul.mubr.f32.gmra.mrb[6].mxu1 %v1287_v57 }
 0x3cc   : > { %3059 = vmatpush3.bf16.msra.mxu1 %v3056_v54  ;;  %v1258_v54 = vpop.permute.xlu1 %1257 }
 0x3cd   : > { %v1288_v30 = vmul.f32 %v2538_v22, %v1243_v31  ;;  %v2539_v55 = vpop.f32.mrb[18].mxu0  ;;  %3061 = vmatprep.subr.bf16.mxu1 %v3060_v52 }
 0x3ce   : > { %v2540_v60 = vpop.f32.mrb[19].mxu0 }
 0x3cf   : > { %v2541_v58 = vadd.f32 %v2540_v60, %v2539_v55  ;;  %2808 = vmatprep.mubr.f32.mxu1 %v1288_v30  ;;  %v1263_v55 = vpop.permute.xlu0 %1262 }
 0x3d0   : > { %3063 = vmatpush3.bf16.msra.mxu1 %v3060_v52 }
 0x3d1   : > { %v1289_v56 = vmul.f32 %v2541_v58, %v1248_v24  ;;  %v2542_v23 = vpop.f32.mrb[20].mxu0 }
 0x3d2   : > { %v2543_v26 = vpop.f32.mrb[21].mxu0 }
 0x3d3   : > { %v2544_v59 = vadd.f32 %v2543_v26, %v2542_v23  ;;  %2809 = vmatmul.mubr.f32.gmra.mrb[8].mxu1 %v1289_v56  ;;  %v1268_v23 = vpop.permute.xlu1 %1267 }
 0x3d5   : > { %v1290_v48 = vmul.f32 %v2544_v59, %v1253_v27  ;;  %v2545_v49 = vpop.f32.mrb[22].mxu0 }
 0x3d6   : > { %v2546_v25 = vpop.f32.mrb[23].mxu0 }
 0x3d7   : > { %v2547_v29 = vadd.f32 %v2546_v25, %v2545_v49  ;;  %2811 = vmatprep.mubr.f32.mxu1 %v1290_v48  ;;  %v1273_v49 = vpop.permute.xlu0 %1272 }
 0x3d9   : > { %v1291_v22 = vmul.f32 %v2547_v29, %v1258_v54  ;;  %v2548_v31 = vpop.f32.mrb[24].mxu0 }
 0x3da   : > { %v2549_v20 = vpop.f32.mrb[25].mxu0 }
 0x3db   : > { %v2550_v21 = vadd.f32 %v2549_v20, %v2548_v31  ;;  %2812 = vmatmul.mubr.f32.gmra.mrb[10].mxu1 %v1291_v22  ;;  %v1278_v20 = vpop.permute.xlu1 %1277 }
 0x3dd   : > { %v1292_v60 = vmul.f32 %v2550_v21, %v1263_v55  ;;  %v2551_v52 = vpop.f32.mrb[26].mxu0 }
 0x3de   : > { %v2552_v58 = vpop.f32.mrb[27].mxu0 }
 0x3df   : > { %v2553_v24 = vadd.f32 %v2552_v58, %v2551_v52  ;;  %2814 = vmatprep.mubr.f32.mxu1 %v1292_v60 }
 0x3e1   : > { %v1293_v26 = vmul.f32 %v2553_v24, %v1268_v23  ;;  %v2554_v18 = vpop.f32.mrb[28].mxu0 }
 0x3e2   : > { %v2555_v59 = vpop.f32.mrb[29].mxu0 }
 0x3e3   : > { %v2556_v27 = vadd.f32 %v2555_v59, %v2554_v18  ;;  %2815 = vmatmul.mubr.f32.gmra.mrb[12].mxu1 %v1293_v26 }
 0x3e5   : > { %v1294_v25 = vmul.f32 %v2556_v27, %v1273_v49  ;;  %v2557_v19 = vpop.f32.mrb[30].mxu0 }
 0x3e6   : > { %v2558_v29 = vpop.f32.mrb[31].mxu0 }
 0x3e7   : > { %v2559_v54 = vadd.f32 %v2558_v29, %v2557_v19  ;;  %2817 = vmatprep.mubr.f32.mxu1 %v1294_v25 }
 0x3e9   : > { %v1295_v31 = vmul.f32 %v2559_v54, %v1278_v20 }
 0x3eb   : > { %2818 = vmatmul.mubr.f32.gmra.mrb[14].mxu1 %v1295_v31 }
 0x3ec   : > { %2852 = vmatprep.mubr.f32.mxu1 %v4134_v62 }
 0x3ef   : > { %2853 = vmatmul.mubr.f32.vlgmr.msra.gmra.mrb[16].mxu1 %v4137_v28 }
 0x3f0   : > { %2855 = vmatprep.mubr.f32.mxu1 %v4140_v50 }
 0x3f3   : > { %2856 = vmatmul.mubr.f32.gmra.mrb[18].mxu1 %v4143_v61 }
 0x3f4   : > { %2858 = vmatprep.mubr.f32.mxu1 %v4146_v53 }
 0x3f7   : > { %2859 = vmatmul.mubr.f32.gmra.mrb[20].mxu1 %v4149_v63 }
 0x3f8   : > { %2861 = vmatprep.mubr.f32.mxu1 %v4152_v51 }
 0x3fb   : > { %2862 = vmatmul.mubr.f32.gmra.mrb[22].mxu1 %v1287_v57 }
 0x3fc   : > { %2864 = vmatprep.mubr.f32.mxu1 %v1288_v30 }
 0x3ff   : > { %2865 = vmatmul.mubr.f32.gmra.mrb[24].mxu1 %v1289_v56 }
 0x400   : > { %2867 = vmatprep.mubr.f32.mxu1 %v1290_v48 }
 0x403   : > { %2868 = vmatmul.mubr.f32.gmra.mrb[26].mxu1 %v1291_v22 }
 0x404   : > { %2870 = vmatprep.mubr.f32.mxu1 %v1292_v60  ;;  %v2372_v60 = vld [vmem:[%s4377_s6] ss:$0 sm:$0xff] }
 0x407   : > { %2871 = vmatmul.mubr.f32.gmra.mrb[28].mxu1 %v1293_v26 }
 0x408   : > { %2873 = vmatprep.mubr.f32.mxu1 %v1294_v25 }
 0x40b   : > { %2874 = vmatmul.mubr.f32.gmra.mrb[30].mxu1 %v1295_v31 }
 0x486   : > { %v2798_v18 = vpop.f32.mrb[0].mxu1 }
 0x487   : > { %1459 = vst [vmem:[%s4163_s10 + $0x8] sm:$0xff] %v2798_v18  ;;  %v1378_v19 = vpop.f32.mrb[1].mxu1 }
 0x488   : > { %1458 = vst [vmem:[%s4163_s10] sm:$0xff] %v1378_v19 }
 0x48e   : > { %v2801_v21 = vpop.f32.mrb[2].mxu1 }
 0x48f   : > { %1461 = vst [vmem:[%s4163_s10 + $0x18] sm:$0xff] %v2801_v21  ;;  %v1388_v62 = vpop.f32.mrb[3].mxu1 }
 0x490   : > { %1460 = vst [vmem:[%s4163_s10 + $0x10] sm:$0xff] %v1388_v62 }
 0x496   : > { %v2804_v28 = vpop.f32.mrb[4].mxu1 }
 0x497   : > { %1463 = vst [vmem:[%s4163_s10 + $0x28] sm:$0xff] %v2804_v28  ;;  %v1398_v50 = vpop.f32.mrb[5].mxu1 }
 0x498   : > { %1462 = vst [vmem:[%s4163_s10 + $0x20] sm:$0xff] %v1398_v50 }
 0x49e   : > { %v2807_v61 = vpop.f32.mrb[6].mxu1 }
 0x49f   : > { %1465 = vst [vmem:[%s4163_s10 + $0x38] sm:$0xff] %v2807_v61  ;;  %v1408_v53 = vpop.f32.mrb[7].mxu1 }
 0x4a0   : > { %1464 = vst [vmem:[%s4163_s10 + $0x30] sm:$0xff] %v1408_v53 }
 0x4a6   : > { %v2810_v63 = vpop.f32.mrb[8].mxu1 }
 0x4a7   : > { %1467 = vst [vmem:[%s4163_s10 + $0x48] sm:$0xff] %v2810_v63  ;;  %v1418_v51 = vpop.f32.mrb[9].mxu1 }
 0x4a8   : > { %1466 = vst [vmem:[%s4163_s10 + $0x40] sm:$0xff] %v1418_v51 }
 0x4ae   : > { %v2813_v57 = vpop.f32.mrb[10].mxu1 }
 0x4af   : > { %1469 = vst [vmem:[%s4163_s10 + $0x58] sm:$0xff] %v2813_v57  ;;  %v1428_v30 = vpop.f32.mrb[11].mxu1 }
 0x4b0   : > { %1468 = vst [vmem:[%s4163_s10 + $0x50] sm:$0xff] %v1428_v30 }
 0x4b6   : > { %v2816_v56 = vpop.f32.mrb[12].mxu1 }
 0x4b7   : > { %1471 = vst [vmem:[%s4163_s10 + $0x68] sm:$0xff] %v2816_v56  ;;  %v1438_v48 = vpop.f32.mrb[13].mxu1 }
 0x4b8   : > { %1470 = vst [vmem:[%s4163_s10 + $0x60] sm:$0xff] %v1438_v48 }
 0x4be   : > { %v2819_v22 = vpop.f32.mrb[14].mxu1 }
 0x4bf   : > { %1473 = vst [vmem:[%s4163_s10 + $0x78] sm:$0xff] %v2819_v22  ;;  %v1448_v55 = vpop.f32.mrb[15].mxu1 }
 0x4c0   : > { %1472 = vst [vmem:[%s4163_s10 + $0x70] sm:$0xff] %v1448_v55 }
 0x4c2   : > { %v2854_v52 = vpop.f32.mrb[16].mxu1 }
 0x4c3   : > { %v1569_v58 = vadd.f32 %v2854_v52, %v2372_v60  ;;  %v1563_v24 = vpop.f32.mrb[17].mxu1 }
 0x4c4   : > { %v1564_v23 = vadd.f32 %v2372_v60, %v1563_v24 }
 0x4c5   : > { %v1643_v26 = vmax.f32 %v1569_v58, 0.0 }
 0x4c6   : > { %v1642_v59 = vmax.f32 %v1564_v23, 0.0  ;;  %v2857_v27 = vpop.f32.mrb[18].mxu1 }
 0x4c7   : > { %1660 = vst [vmem:[%s4185_s11 + $0x8] sm:$0xff] %v1643_v26  ;;  %v1579_v49 = vadd.f32 %v2857_v27, %v2372_v60  ;;  %v1573_v25 = vpop.f32.mrb[19].mxu1 }
 0x4c8   : > { %1659 = vst [vmem:[%s4185_s11] sm:$0xff] %v1642_v59  ;;  %v1574_v29 = vadd.f32 %v2372_v60, %v1573_v25 }
 0x4c9   : > { %v1645_v54 = vmax.f32 %v1579_v49, 0.0 }
 0x4ca   : > { %v1644_v20 = vmax.f32 %v1574_v29, 0.0  ;;  %v2860_v31 = vpop.f32.mrb[20].mxu1 }
 0x4cb   : > { %1662 = vst [vmem:[%s4185_s11 + $0x18] sm:$0xff] %v1645_v54  ;;  %v1589_v18 = vadd.f32 %v2860_v31, %v2372_v60  ;;  %v1583_v19 = vpop.f32.mrb[21].mxu1 }
 0x4cc   : > { %1661 = vst [vmem:[%s4185_s11 + $0x10] sm:$0xff] %v1644_v20  ;;  %v1584_v21 = vadd.f32 %v2372_v60, %v1583_v19 }
 0x4cd   : > { %v1647_v62 = vmax.f32 %v1589_v18, 0.0 }
 0x4ce   : > { %v1646_v28 = vmax.f32 %v1584_v21, 0.0  ;;  %v2863_v50 = vpop.f32.mrb[22].mxu1 }
 0x4cf   : > { %1664 = vst [vmem:[%s4185_s11 + $0x28] sm:$0xff] %v1647_v62  ;;  %v1599_v61 = vadd.f32 %v2863_v50, %v2372_v60  ;;  %v1593_v53 = vpop.f32.mrb[23].mxu1 }
 0x4d0   : > { %1663 = vst [vmem:[%s4185_s11 + $0x20] sm:$0xff] %v1646_v28  ;;  %v1594_v63 = vadd.f32 %v2372_v60, %v1593_v53 }
 0x4d1   : > { %v1649_v51 = vmax.f32 %v1599_v61, 0.0 }
 0x4d2   : > { %v1648_v57 = vmax.f32 %v1594_v63, 0.0  ;;  %v2866_v30 = vpop.f32.mrb[24].mxu1 }
 0x4d3   : > { %1666 = vst [vmem:[%s4185_s11 + $0x38] sm:$0xff] %v1649_v51  ;;  %v1609_v56 = vadd.f32 %v2866_v30, %v2372_v60  ;;  %v1603_v48 = vpop.f32.mrb[25].mxu1 }
 0x4d4   : > { %1665 = vst [vmem:[%s4185_s11 + $0x30] sm:$0xff] %v1648_v57  ;;  %v1604_v22 = vadd.f32 %v2372_v60, %v1603_v48 }
 0x4d5   : > { %v1651_v55 = vmax.f32 %v1609_v56, 0.0 }
 0x4d6   : > { %v1650_v52 = vmax.f32 %v1604_v22, 0.0  ;;  %v2869_v58 = vpop.f32.mrb[26].mxu1 }
 0x4d7   : > { %1668 = vst [vmem:[%s4185_s11 + $0x48] sm:$0xff] %v1651_v55  ;;  %v1619_v24 = vadd.f32 %v2869_v58, %v2372_v60  ;;  %v1613_v23 = vpop.f32.mrb[27].mxu1 }
 0x4d8   : > { %1667 = vst [vmem:[%s4185_s11 + $0x40] sm:$0xff] %v1650_v52  ;;  %v1614_v26 = vadd.f32 %v2372_v60, %v1613_v23 }
 0x4d9   : > { %v1653_v59 = vmax.f32 %v1619_v24, 0.0 }
 0x4da   : > { %v1652_v27 = vmax.f32 %v1614_v26, 0.0  ;;  %v2872_v49 = vpop.f32.mrb[28].mxu1 }
 0x4db   : > { %1670 = vst [vmem:[%s4185_s11 + $0x58] sm:$0xff] %v1653_v59  ;;  %v1629_v25 = vadd.f32 %v2872_v49, %v2372_v60  ;;  %v1623_v29 = vpop.f32.mrb[29].mxu1 }
 0x4dc   : > { %1669 = vst [vmem:[%s4185_s11 + $0x50] sm:$0xff] %v1652_v27  ;;  %v1624_v54 = vadd.f32 %v2372_v60, %v1623_v29 }
 0x4dd   : > { %v1655_v20 = vmax.f32 %v1629_v25, 0.0 }
 0x4de   : > { %v1654_v31 = vmax.f32 %v1624_v54, 0.0  ;;  %v2875_v18 = vpop.f32.mrb[30].mxu1 }
 0x4df   : > { %1672 = vst [vmem:[%s4185_s11 + $0x68] sm:$0xff] %v1655_v20  ;;  %v1639_v19 = vadd.f32 %v2875_v18, %v2372_v60  ;;  %v1633_v21 = vpop.f32.mrb[31].mxu1 }
 0x4e0   : > { %1671 = vst [vmem:[%s4185_s11 + $0x60] sm:$0xff] %v1654_v31  ;;  %v1634_v62 = vadd.f32 %v2372_v60, %v1633_v21 }
 0x4e1   : > { %v1657_v28 = vmax.f32 %v1639_v19, 0.0 }
 0x4e2   : > { %v1656_v50 = vmax.f32 %v1634_v62, 0.0 }
 0x4e3   : > { %1674 = vst [vmem:[%s4185_s11 + $0x78] sm:$0xff] %v1657_v28 }
 0x4e4   : > { %1673 = vst [vmem:[%s4185_s11 + $0x70] sm:$0xff] %v1656_v50 }
 0x4e5 PF: > { %p2373_p12 = scmp.ne.s32.totalorder %s3475_s17, 2 }
 0x4e6   : > { %1775 = vmatprep.mubr.f32.mxu0 (!%p2373_p12), %v3763_v1  ;;  %v3497_v48 = vmov (!%p2373_p12), 0   ;;  %v1952_v31 = vld [vmem:[#allocation11] sm:$0xff] (!%p2373_p12)  ;;  %v1953_v18 = vld [vmem:[#allocation11 + $0x8] sm:$0xff] (!%p2373_p12)  ;;  %v1954_v19 = vld [vmem:[#allocation11 + $0x10] sm:$0xff] (!%p2373_p12)  ;;  %s4253_s17 = scalar_lea.vmem (!%p2373_p12), [#allocation4], %s3752_s18 }
 0x4e7   : > { %1678 = sbr.rel (%p2373_p12) target bundleno = 1789 (0x6fd), region = 88  ;;  %3267 = vset.pattern.permute.xlu0 (!%p2373_p12), %v3497_v48  ;;  %3268 = vset.pattern.permute.xlu1 (!%p2373_p12), %v3497_v48  ;;  %v1955_v21 = vld [vmem:[#allocation11 + $0x18] sm:$0xff] (!%p2373_p12)  ;;  %v3096_v62 = vpack.c.bf16 (!%p2373_p12), %v1953_v18, %v1952_v31 }
 0x4e8   : > { %1858 = vperm.xlu0 (!%p2373_p12), %3267, %v3858_v32   ;;  %1868 = vperm.xlu1 (!%p2373_p12), %3268, %v3862_v34  }
 0x4e9   : > { %3097 = vmatprep.subr.bf16.mxu1 (!%p2373_p12), %v3096_v62 }
 0x4ea   : > { %3099 = vmatpush3.bf16.msra.mxu1 (!%p2373_p12), %v3096_v62 }
 0x4eb   : > { %v1695_v61 = vld [vmem:[#allocation3 + $0x80] sm:$0xff] (!%p2373_p12)  ;;  %v1696_v53 = vld [vmem:[#allocation3 + $0x88] sm:$0xff] (!%p2373_p12)  ;;  %v1697_v30 = vld [vmem:[#allocation3 + $0x90] sm:$0xff] (!%p2373_p12) }
 0x4ec   : > { %v1679_v63 = vld [vmem:[#allocation3] sm:$0xff] (!%p2373_p12)  ;;  %v3064_v51 = vpack.c.bf16 (!%p2373_p12), %v1696_v53, %v1695_v61  ;;  %v1680_v57 = vld [vmem:[#allocation3 + $0x8] sm:$0xff] (!%p2373_p12)  ;;  %v1698_v56 = vld [vmem:[#allocation3 + $0x98] sm:$0xff] (!%p2373_p12)  ;;  %1863 = vperm.xlu0 (!%p2373_p12), %3267, %v3860_v33   ;;  %1873 = vperm.xlu1 (!%p2373_p12), %3268, %v3864_v35   ;;  %v3100_v53 = vpack.c.bf16 (!%p2373_p12), %v1955_v21, %v1954_v19 }
 0x4ed   : > { %v3066_v60 = vpack.c.bf16 (!%p2373_p12), %v1680_v57, %v1679_v63  ;;  %v3068_v22 = vpack.c.bf16 (!%p2373_p12), %v1698_v56, %v1697_v30  ;;  %v1681_v55 = vld [vmem:[#allocation3 + $0x10] sm:$0xff] (!%p2373_p12)  ;;  %v1682_v52 = vld [vmem:[#allocation3 + $0x18] sm:$0xff] (!%p2373_p12)  ;;  %v1699_v58 = vld [vmem:[#allocation3 + $0xa0] sm:$0xff] (!%p2373_p12) }
 0x4ee   : > { %3065 = vmatprep.subr.bf16.mxu0 %v3064_v51  ;;  %v1700_v24 = vld [vmem:[#allocation3 + $0xa8] sm:$0xff]  ;;  %v3070_v1 = vpack.c.bf16 %v1682_v52, %v1681_v55  ;;  %v1683_v26 = vld [vmem:[#allocation3 + $0x20] sm:$0xff]  ;;  %v1701_v27 = vld [vmem:[#allocation3 + $0xb0] sm:$0xff]  ;;  %3101 = vmatprep.subr.bf16.mxu1 %v3100_v53 }
 0x4ef   : > { %3067 = vmatpush3.bf16.msra.mxu0 %v3066_v60  ;;  %v3072_v23 = vpack.c.bf16 %v1700_v24, %v1699_v58  ;;  %v1684_v59 = vld [vmem:[#allocation3 + $0x28] sm:$0xff]  ;;  %v1702_v49 = vld [vmem:[#allocation3 + $0xb8] sm:$0xff]  ;;  %v1685_v29 = vld [vmem:[#allocation3 + $0x30] sm:$0xff]  ;;  %3103 = vmatpush3.bf16.msra.mxu1 %v3100_v53 }
 0x4f0   : > { %3069 = vmatprep.subr.bf16.mxu0 %v3068_v22  ;;  %v3074_v25 = vpack.c.bf16 %v1684_v59, %v1683_v26  ;;  %v3076_v32 = vpack.c.bf16 %v1702_v49, %v1701_v27  ;;  %v1686_v34 = vld [vmem:[#allocation3 + $0x38] sm:$0xff]  ;;  %v1703_v54 = vld [vmem:[#allocation3 + $0xc0] sm:$0xff]  ;;  %v1704_v20 = vld [vmem:[#allocation3 + $0xc8] sm:$0xff]  ;;  %1878 = vperm.xlu0 %3267, %v3866_v36  }
 0x4f1   : > { %1883 = vperm.xlu1 %3268, %v3868_v37   ;;  %v3078_v33 = vpack.c.bf16 %v1686_v34, %v1685_v29  ;;  %v3080_v35 = vpack.c.bf16 %v1704_v20, %v1703_v54  ;;  %v1687_v28 = vld [vmem:[#allocation3 + $0x40] sm:$0xff]  ;;  %v1688_v50 = vld [vmem:[#allocation3 + $0x48] sm:$0xff]  ;;  %v1705_v61 = vld [vmem:[#allocation3 + $0xd0] sm:$0xff] }
 0x4f2   : > { %v1706_v63 = vld [vmem:[#allocation3 + $0xd8] sm:$0xff]  ;;  %v1956_v36 = vld [vmem:[#allocation11 + $0x20] sm:$0xff]  ;;  %v3082_v51 = vpack.c.bf16 %v1688_v50, %v1687_v28  ;;  %v1707_v48 = vld [vmem:[#allocation3 + $0xe0] sm:$0xff] }
 0x4f3   : > { %3071 = vmatpush3.bf16.msra.mxu0 %v3070_v1  ;;  %v1957_v37 = vld [vmem:[#allocation11 + $0x28] sm:$0xff]  ;;  %v3084_v57 = vpack.c.bf16 %v1706_v63, %v1705_v61  ;;  %v1689_v30 = vld [vmem:[#allocation3 + $0x50] sm:$0xff]  ;;  %v1708_v22 = vld [vmem:[#allocation3 + $0xe8] sm:$0xff] }
 0x4f4   : > { %3073 = vmatprep.subr.bf16.mxu0 %v3072_v23  ;;  %1888 = vperm.xlu0 %3267, %v3870_v38   ;;  %v1690_v56 = vld [vmem:[#allocation3 + $0x58] sm:$0xff]  ;;  %v3104_v60 = vpack.c.bf16 %v1957_v37, %v1956_v36  ;;  %v1958_v38 = vld [vmem:[#allocation11 + $0x30] sm:$0xff]  ;;  %v3088_v52 = vpack.c.bf16 %v1708_v22, %v1707_v48  ;;  %v1692_v24 = vld [vmem:[#allocation3 + $0x68] sm:$0xff] }
 0x4f5   : > { %1893 = vperm.xlu1 %3268, %v3872_v39   ;;  %v1959_v39 = vld [vmem:[#allocation11 + $0x38] sm:$0xff]  ;;  %v3086_v55 = vpack.c.bf16 %v1690_v56, %v1689_v30  ;;  %v1691_v58 = vld [vmem:[#allocation3 + $0x60] sm:$0xff]  ;;  %v1709_v1 = vld [vmem:[#allocation3 + $0xf0] sm:$0xff] }
 0x4f6   : > { %3105 = vmatprep.subr.bf16.mxu1 %v3104_v60  ;;  %v3108_v23 = vpack.c.bf16 %v1959_v39, %v1958_v38  ;;  %v1710_v26 = vld [vmem:[#allocation3 + $0xf8] sm:$0xff]  ;;  %v1693_v49 = vld [vmem:[#allocation3 + $0x70] sm:$0xff]  ;;  %v1962_v29 = vld [vmem:[#allocation11 + $0x50] sm:$0xff] }
 0x4f7   : > { %3075 = vmatpush3.bf16.msra.mxu0 %v3074_v25  ;;  %v1961_v59 = vld [vmem:[#allocation11 + $0x48] sm:$0xff]  ;;  %3107 = vmatpush3.bf16.msra.mxu1 %v3104_v60  ;;  %v3092_v27 = vpack.c.bf16 %v1710_v26, %v1709_v1  ;;  %v1963_v34 = vld [vmem:[#allocation11 + $0x58] sm:$0xff] }
 0x4f8   : > { %3077 = vmatprep.subr.bf16.mxu0 %v3076_v32  ;;  %1898 = vperm.xlu0 %3267, %v3874_v40   ;;  %v1960_v40 = vld [vmem:[#allocation11 + $0x40] sm:$0xff]  ;;  %v1694_v25 = vld [vmem:[#allocation3 + $0x78] sm:$0xff] }
 0x4f9   : > { %1903 = vperm.xlu1 %3268, %v3876_v41   ;;  %v3090_v41 = vpack.c.bf16 %v1692_v24, %v1691_v58  ;;  %3109 = vmatprep.subr.bf16.mxu1 %v3108_v23  ;;  %v3112_v32 = vpack.c.bf16 %v1961_v59, %v1960_v40 }
 0x4fb   : > { %3079 = vmatpush3.bf16.msra.mxu0 %v3078_v33  ;;  %3111 = vmatpush3.bf16.msra.mxu1 %v3108_v23 }
 0x4fc   : > { %3081 = vmatprep.subr.bf16.mxu0 %v3080_v35  ;;  %1908 = vperm.xlu0 %3267, %v3878_v42   ;;  %v3094_v42 = vpack.c.bf16 %v1694_v25, %v1693_v49 }
 0x4fd   : > { %1913 = vperm.xlu1 %3268, %v3880_v43   ;;  %3113 = vmatprep.subr.bf16.mxu1 %v3112_v32  ;;  %v3116_v43 = vpack.c.bf16 %v1963_v34, %v1962_v29 }
 0x4ff   : > { %3083 = vmatpush3.bf16.msra.mxu0 %v3082_v51  ;;  %3115 = vmatpush3.bf16.msra.mxu1 %v3112_v32 }
 0x500   : > { %3085 = vmatprep.subr.bf16.mxu0 %v3084_v57  ;;  %1918 = vperm.xlu0 %3267, %v3882_v44   ;;  %v1966_v44 = vld [vmem:[#allocation11 + $0x70] sm:$0xff] }
 0x501   : > { %1923 = vperm.xlu1 %3268, %v3884_v45   ;;  %3117 = vmatprep.subr.bf16.mxu1 %v3116_v43  ;;  %v1967_v45 = vld [vmem:[#allocation11 + $0x78] sm:$0xff] }
 0x503   : > { %3087 = vmatpush3.bf16.msra.mxu0 %v3086_v55  ;;  %3119 = vmatpush3.bf16.msra.mxu1 %v3116_v43 }
 0x504   : > { %3089 = vmatprep.subr.bf16.mxu0 %v3088_v52  ;;  %1928 = vperm.xlu0 %3267, %v3886_v46   ;;  %v3124_v46 = vpack.c.bf16 %v1967_v45, %v1966_v44 }
 0x505   : > { %1933 = vperm.xlu1 %3268, %v3888_v47  }
 0x507   : > { %3091 = vmatpush3.bf16.msra.mxu0 %v3090_v41 }
 0x508   : > { %3093 = vmatprep.subr.bf16.mxu0 %v3092_v27 }
 0x50b   : > { %3095 = vmatpush3.bf16.msra.mxu0 %v3094_v42 }
 0x50e   : > { %1776 = vmatmul.mubr.f32.vlgmr.msra.gmra.mrb[0].mxu0 %v3760_v0  ;;  %v4452_v0 = vld [vmem:[#allocation29_spill] sm:$0xff] }
 0x50f   : > { %1780 = vmatprep.mubr.f32.mxu0 %v3769_v3  ;;  %v4454_v3 = vld [vmem:[#allocation31_spill] sm:$0xff] }
 0x512   : > { %1781 = vmatmul.mubr.f32.gmra.mrb[2].mxu0 %v3766_v2  ;;  %v4453_v2 = vld [vmem:[#allocation28_spill] sm:$0xff] }
 0x513   : > { %1785 = vmatprep.mubr.f32.mxu0 %v3775_v5  ;;  %v4456_v5 = vld [vmem:[#allocation33_spill] sm:$0xff] }
 0x516   : > { %1786 = vmatmul.mubr.f32.gmra.mrb[4].mxu0 %v3772_v4  ;;  %v4455_v4 = vld [vmem:[#allocation30_spill] sm:$0xff] }
 0x517   : > { %1790 = vmatprep.mubr.f32.mxu0 %v3781_v7  ;;  %v4458_v7 = vld [vmem:[#allocation35_spill] sm:$0xff] }
 0x51a   : > { %1791 = vmatmul.mubr.f32.gmra.mrb[6].mxu0 %v3778_v6  ;;  %v4457_v6 = vld [vmem:[#allocation32_spill] sm:$0xff] }
 0x51b   : > { %1795 = vmatprep.mubr.f32.mxu0 %v3787_v9  ;;  %v4460_v9 = vld [vmem:[#allocation37_spill] sm:$0xff] }
 0x51e   : > { %1796 = vmatmul.mubr.f32.gmra.mrb[8].mxu0 %v3784_v8  ;;  %v4459_v8 = vld [vmem:[#allocation34_spill] sm:$0xff] }
 0x51f   : > { %1800 = vmatprep.mubr.f32.mxu0 %v3793_v11  ;;  %v4462_v11 = vld [vmem:[#allocation39_spill] sm:$0xff] }
 0x522   : > { %1801 = vmatmul.mubr.f32.gmra.mrb[10].mxu0 %v3790_v10  ;;  %v4461_v10 = vld [vmem:[#allocation36_spill] sm:$0xff] }
 0x523   : > { %1805 = vmatprep.mubr.f32.mxu0 %v3799_v13  ;;  %v4464_v13 = vld [vmem:[#allocation41_spill] sm:$0xff] }
 0x526   : > { %1806 = vmatmul.mubr.f32.gmra.mrb[12].mxu0 %v3796_v12  ;;  %v4463_v12 = vld [vmem:[#allocation38_spill] sm:$0xff] }
 0x527   : > { %1810 = vmatprep.mubr.f32.mxu0 %v3805_v15  ;;  %v1964_v15 = vld [vmem:[#allocation11 + $0x60] sm:$0xff] }
 0x52a   : > { %1811 = vmatmul.mubr.f32.gmra.mrb[14].mxu0 %v3802_v14  ;;  %v4465_v14 = vld [vmem:[#allocation40_spill] sm:$0xff] }
 0x52b   : > { %1815 = vmatprep.mubr.f32.mxu0 %v3811_v17 }
 0x52e   : > { %1816 = vmatmul.mubr.f32.gmra.mrb[16].mxu0 %v3808_v16  ;;  %v1965_v16 = vld [vmem:[#allocation11 + $0x68] sm:$0xff] }
 0x52f   : > { %1820 = vmatprep.mubr.f32.mxu0 %v4452_v0  ;;  %v3120_v17 = vpack.c.bf16 %v1965_v16, %v1964_v15 }
 0x531   : > { %3121 = vmatprep.subr.bf16.mxu1 %v3120_v17 }
 0x532   : > { %1821 = vmatmul.mubr.f32.gmra.mrb[18].mxu0 %v4453_v2  ;;  %3123 = vmatpush3.bf16.msra.mxu1 %v3120_v17 }
 0x533   : > { %1825 = vmatprep.mubr.f32.mxu0 %v4454_v3  ;;  %3125 = vmatprep.subr.bf16.mxu1 %v3124_v46 }
 0x536   : > { %1826 = vmatmul.mubr.f32.gmra.mrb[20].mxu0 %v4455_v4  ;;  %3127 = vmatpush3.bf16.msra.mxu1 %v3124_v46 }
 0x537   : > { %1830 = vmatprep.mubr.f32.mxu0 %v4456_v5 }
 0x53a   : > { %1831 = vmatmul.mubr.f32.gmra.mrb[22].mxu0 %v4457_v6 }
 0x53b   : > { %1835 = vmatprep.mubr.f32.mxu0 %v4458_v7 }
 0x53e   : > { %1836 = vmatmul.mubr.f32.gmra.mrb[24].mxu0 %v4459_v8 }
 0x53f   : > { %1840 = vmatprep.mubr.f32.mxu0 %v4460_v9 }
 0x542   : > { %1841 = vmatmul.mubr.f32.gmra.mrb[26].mxu0 %v4461_v10 }
 0x543   : > { %1845 = vmatprep.mubr.f32.mxu0 %v4462_v11 }
 0x546   : > { %1846 = vmatmul.mubr.f32.gmra.mrb[28].mxu0 %v4463_v12 }
 0x547   : > { %1850 = vmatprep.mubr.f32.mxu0 %v4464_v13 }
 0x54a   : > { %1851 = vmatmul.mubr.f32.gmra.mrb[30].mxu0 %v4465_v14 }
 0x567   : > { %v1859_v47 = vpop.permute.xlu0 %1858  ;;  %v1869_v50 = vpop.permute.xlu1 %1868 }
 0x56b   : > { %v1864_v33 = vpop.permute.xlu0 %1863  ;;  %v1874_v57 = vpop.permute.xlu1 %1873 }
 0x56f   : > { %v1879_v22 = vpop.permute.xlu0 %1878 }
 0x570   : > { %v1884_v58 = vpop.permute.xlu1 %1883 }
 0x573   : > { %v1889_v40 = vpop.permute.xlu0 %1888 }
 0x574   : > { %v1894_v25 = vpop.permute.xlu1 %1893 }
 0x577   : > { %v1899_v43 = vpop.permute.xlu0 %1898 }
 0x578   : > { %v1904_v5 = vpop.permute.xlu1 %1903 }
 0x57b   : > { %v1909_v10 = vpop.permute.xlu0 %1908 }
 0x57c   : > { %v1914_v15 = vpop.permute.xlu1 %1913 }
 0x57f   : > { %v1919_v46 = vpop.permute.xlu0 %1918 }
 0x5e1   : > { %v2656_v54 = vpop.f32.mrb[0].mxu0 }
 0x5e2   : > { %v2657_v20 = vpop.f32.mrb[1].mxu0 }
 0x5e3   : > { %v2658_v31 = vadd.f32 %v2657_v20, %v2656_v54 }
 0x5e5   : > { %v2659_v18 = vpop.f32.mrb[2].mxu0  ;;  %v1936_v19 = vmul.f32 %v2658_v31, %v1859_v47 }
 0x5e6   : > { %v2660_v21 = vpop.f32.mrb[3].mxu0 }
 0x5e7   : > { %v2661_v62 = vadd.f32 %v2660_v21, %v2659_v18  ;;  %2908 = vmatprep.mubr.f32.mxu1 %v1936_v19  ;;  %v1924_v18 = vpop.permute.xlu1 %1923 }
 0x5e9   : > { %v1937_v35 = vmul.f32 %v2661_v62, %v1864_v33  ;;  %v2662_v28 = vpop.f32.mrb[4].mxu0 }
 0x5ea   : > { %v2663_v61 = vpop.f32.mrb[5].mxu0 }
 0x5eb   : > { %v2664_v53 = vadd.f32 %v2663_v61, %v2662_v28  ;;  %2909 = vmatmul.mubr.f32.vlgmr.msra.gmra.mrb[0].mxu1 %v1937_v35  ;;  %v1929_v35 = vpop.permute.xlu0 %1928 }
 0x5ed   : > { %v1938_v63 = vmul.f32 %v2664_v53, %v1869_v50  ;;  %v2665_v36 = vpop.f32.mrb[6].mxu0 }
 0x5ee   : > { %v2666_v37 = vpop.f32.mrb[7].mxu0 }
 0x5ef   : > { %v2667_v51 = vadd.f32 %v2666_v37, %v2665_v36  ;;  %2911 = vmatprep.mubr.f32.mxu1 %v1938_v63  ;;  %v1934_v63 = vpop.permute.xlu1 %1933  ;;  %v2115_v37 = vld [vmem:[%s4253_s17 + $0x8] sm:$0xff] }
 0x5f1   : > { %v1939_v30 = vmul.f32 %v2667_v51, %v1874_v57  ;;  %v2668_v56 = vpop.f32.mrb[8].mxu0  ;;  %v2114_v51 = vld [vmem:[%s4253_s17] sm:$0xff] }
 0x5f2   : > { %v2669_v48 = vpop.f32.mrb[9].mxu0 }
 0x5f3   : > { %v2670_v60 = vadd.f32 %v2669_v48, %v2668_v56  ;;  %2912 = vmatmul.mubr.f32.gmra.mrb[2].mxu1 %v1939_v30  ;;  %v4260_v30 = vld [vmem:[%s4380_s9] ss:$0 sm:$0xff] }
 0x5f5   : > { %v1940_v38 = vmul.f32 %v2670_v60, %v1879_v22  ;;  %v2671_v39 = vpop.f32.mrb[10].mxu0 }
 0x5f6   : > { %v2672_v55 = vpop.f32.mrb[11].mxu0 }
 0x5f7   : > { %v2673_v52 = vadd.f32 %v2672_v55, %v2671_v39  ;;  %2914 = vmatprep.mubr.f32.mxu1 %v1940_v38  ;;  %v2117_v39 = vld [vmem:[%s4253_s17 + $0x18] sm:$0xff]  ;;  %v2116_v55 = vld [vmem:[%s4253_s17 + $0x10] sm:$0xff] }
 0x5f9   : > { %v1941_v24 = vmul.f32 %v2673_v52, %v1884_v58  ;;  %v2674_v1 = vpop.f32.mrb[12].mxu0 }
 0x5fa   : > { %v2675_v23 = vpop.f32.mrb[13].mxu0 }
 0x5fb   : > { %v2676_v26 = vadd.f32 %v2675_v23, %v2674_v1  ;;  %2915 = vmatmul.mubr.f32.gmra.mrb[4].mxu1 %v1941_v24 }
 0x5fd   : > { %v1942_v59 = vmul.f32 %v2676_v26, %v1889_v40  ;;  %v2677_v41 = vpop.f32.mrb[14].mxu0  ;;  %v2119_v40 = vld [vmem:[%s4253_s17 + $0x28] sm:$0xff] }
 0x5fe   : > { %v2678_v27 = vpop.f32.mrb[15].mxu0 }
 0x5ff   : > { %v2679_v49 = vadd.f32 %v2678_v27, %v2677_v41  ;;  %2917 = vmatprep.mubr.f32.mxu1 %v1942_v59  ;;  %v2118_v59 = vld [vmem:[%s4253_s17 + $0x20] sm:$0xff] }
 0x601   : > { %v1943_v32 = vmul.f32 %v2679_v49, %v1894_v25  ;;  %v2680_v29 = vpop.f32.mrb[16].mxu0 }
 0x602   : > { %v2681_v34 = vpop.f32.mrb[17].mxu0 }
 0x603   : > { %v2682_v42 = vadd.f32 %v2681_v34, %v2680_v29  ;;  %2918 = vmatmul.mubr.f32.gmra.mrb[6].mxu1 %v1943_v32  ;;  %v2121_v34 = vld [vmem:[%s4253_s17 + $0x38] sm:$0xff] }
 0x605   : > { %v1944_v0 = vmul.f32 %v2682_v42, %v1899_v43  ;;  %v2683_v2 = vpop.f32.mrb[18].mxu0  ;;  %v2120_v42 = vld [vmem:[%s4253_s17 + $0x30] sm:$0xff] }
 0x606   : > { %v2684_v3 = vpop.f32.mrb[19].mxu0 }
 0x607   : > { %v2685_v4 = vadd.f32 %v2684_v3, %v2683_v2  ;;  %2920 = vmatprep.mubr.f32.mxu1 %v1944_v0 }
 0x609   : > { %v1945_v6 = vmul.f32 %v2685_v4, %v1904_v5  ;;  %v2686_v7 = vpop.f32.mrb[20].mxu0 }
 0x60a   : > { %v2687_v8 = vpop.f32.mrb[21].mxu0 }
 0x60b   : > { %v2688_v9 = vadd.f32 %v2687_v8, %v2686_v7  ;;  %2921 = vmatmul.mubr.f32.gmra.mrb[8].mxu1 %v1945_v6  ;;  %v2123_v6 = vld [vmem:[%s4253_s17 + $0x48] sm:$0xff]  ;;  %v2122_v7 = vld [vmem:[%s4253_s17 + $0x40] sm:$0xff] }
 0x60d   : > { %v1946_v11 = vmul.f32 %v2688_v9, %v1909_v10  ;;  %v2689_v12 = vpop.f32.mrb[22].mxu0 }
 0x60e   : > { %v2690_v13 = vpop.f32.mrb[23].mxu0 }
 0x60f   : > { %v2691_v14 = vadd.f32 %v2690_v13, %v2689_v12  ;;  %2923 = vmatprep.mubr.f32.mxu1 %v1946_v11 }
 0x611   : > { %v1947_v16 = vmul.f32 %v2691_v14, %v1914_v15  ;;  %v2692_v17 = vpop.f32.mrb[24].mxu0  ;;  %v2125_v14 = vld [vmem:[%s4253_s17 + $0x58] sm:$0xff]  ;;  %v2124_v15 = vld [vmem:[%s4253_s17 + $0x50] sm:$0xff] }
 0x612   : > { %v2693_v44 = vpop.f32.mrb[25].mxu0 }
 0x613   : > { %v2694_v45 = vadd.f32 %v2693_v44, %v2692_v17  ;;  %2924 = vmatmul.mubr.f32.gmra.mrb[10].mxu1 %v1947_v16 }
 0x615   : > { %v1948_v47 = vmul.f32 %v2694_v45, %v1919_v46  ;;  %v2695_v54 = vpop.f32.mrb[26].mxu0 }
 0x616   : > { %v2696_v20 = vpop.f32.mrb[27].mxu0 }
 0x617   : > { %v2697_v31 = vadd.f32 %v2696_v20, %v2695_v54  ;;  %2926 = vmatprep.mubr.f32.mxu1 %v1948_v47  ;;  %v2127_v54 = vld [vmem:[%s4253_s17 + $0x68] sm:$0xff]  ;;  %v2126_v20 = vld [vmem:[%s4253_s17 + $0x60] sm:$0xff] }
 0x619   : > { %v1949_v19 = vmul.f32 %v2697_v31, %v1924_v18  ;;  %v2698_v21 = vpop.f32.mrb[28].mxu0 }
 0x61a   : > { %v2699_v33 = vpop.f32.mrb[29].mxu0 }
 0x61b   : > { %v2700_v62 = vadd.f32 %v2699_v33, %v2698_v21  ;;  %2927 = vmatmul.mubr.f32.gmra.mrb[12].mxu1 %v1949_v19 }
 0x61d   : > { %v1950_v28 = vmul.f32 %v2700_v62, %v1929_v35  ;;  %v2701_v50 = vpop.f32.mrb[30].mxu0  ;;  %v2129_v35 = vld [vmem:[%s4253_s17 + $0x78] sm:$0xff] }
 0x61e   : > { %v2702_v61 = vpop.f32.mrb[31].mxu0 }
 0x61f   : > { %v2703_v53 = vadd.f32 %v2702_v61, %v2701_v50  ;;  %2929 = vmatprep.mubr.f32.mxu1 %v1950_v28  ;;  %v2128_v28 = vld [vmem:[%s4253_s17 + $0x70] sm:$0xff] }
 0x621   : > { %v1951_v36 = vmul.f32 %v2703_v53, %v1934_v63 }
 0x623   : > { %2930 = vmatmul.mubr.f32.gmra.mrb[14].mxu1 %v1951_v36 }
 0x6be   : > { %v2910_v57 = vpop.f32.mrb[0].mxu1 }
 0x6bf   : > { %v2131_v56 = vadd.f32 %v2910_v57, %v2115_v37  ;;  %v2034_v48 = vpop.f32.mrb[1].mxu1 }
 0x6c0   : > { %v2130_v60 = vadd.f32 %v2114_v51, %v2034_v48 }
 0x6c1   : > { %v2154_v22 = vadd.f32 %v4260_v30, %v2131_v56 }
 0x6c2   : > { %v2153_v38 = vadd.f32 %v4260_v30, %v2130_v60 }
 0x6c3   : > { %2170 = vst [vmem:[%s3891_s29 + $0x8] sm:$0xff] %v2154_v22 }
 0x6c4   : > { %2169 = vst [vmem:[%s3891_s29] sm:$0xff] %v2153_v38 }
 0x6c6   : > { %v2913_v52 = vpop.f32.mrb[2].mxu1 }
 0x6c7   : > { %v2133_v58 = vadd.f32 %v2913_v52, %v2117_v39  ;;  %v2044_v24 = vpop.f32.mrb[3].mxu1 }
 0x6c8   : > { %v2132_v1 = vadd.f32 %v2116_v55, %v2044_v24 }
 0x6c9   : > { %v2156_v23 = vadd.f32 %v4260_v30, %v2133_v58 }
 0x6ca   : > { %v2155_v26 = vadd.f32 %v4260_v30, %v2132_v1 }
 0x6cb   : > { %2172 = vst [vmem:[%s3891_s29 + $0x18] sm:$0xff] %v2156_v23 }
 0x6cc   : > { %2171 = vst [vmem:[%s3891_s29 + $0x10] sm:$0xff] %v2155_v26 }
 0x6ce   : > { %v2916_v41 = vpop.f32.mrb[4].mxu1 }
 0x6cf   : > { %v2135_v27 = vadd.f32 %v2916_v41, %v2119_v40  ;;  %v2054_v49 = vpop.f32.mrb[5].mxu1 }
 0x6d0   : > { %v2134_v25 = vadd.f32 %v2118_v59, %v2054_v49 }
 0x6d1   : > { %v2158_v32 = vadd.f32 %v4260_v30, %v2135_v27 }
 0x6d2   : > { %v2157_v29 = vadd.f32 %v4260_v30, %v2134_v25 }
 0x6d3   : > { %2174 = vst [vmem:[%s3891_s29 + $0x28] sm:$0xff] %v2158_v32 }
 0x6d4   : > { %2173 = vst [vmem:[%s3891_s29 + $0x20] sm:$0xff] %v2157_v29 }
 0x6d6   : > { %v2919_v43 = vpop.f32.mrb[6].mxu1 }
 0x6d7   : > { %v2137_v0 = vadd.f32 %v2919_v43, %v2121_v34  ;;  %v2064_v2 = vpop.f32.mrb[7].mxu1 }
 0x6d8   : > { %v2136_v3 = vadd.f32 %v2120_v42, %v2064_v2 }
 0x6d9   : > { %v2160_v4 = vadd.f32 %v4260_v30, %v2137_v0 }
 0x6da   : > { %v2159_v5 = vadd.f32 %v4260_v30, %v2136_v3 }
 0x6db   : > { %2176 = vst [vmem:[%s3891_s29 + $0x38] sm:$0xff] %v2160_v4 }
 0x6dc   : > { %2175 = vst [vmem:[%s3891_s29 + $0x30] sm:$0xff] %v2159_v5 }
 0x6de   : > { %v2922_v8 = vpop.f32.mrb[8].mxu1 }
 0x6df   : > { %v2139_v9 = vadd.f32 %v2922_v8, %v2123_v6  ;;  %v2074_v10 = vpop.f32.mrb[9].mxu1 }
 0x6e0   : > { %v2138_v11 = vadd.f32 %v2122_v7, %v2074_v10 }
 0x6e1   : > { %v2162_v12 = vadd.f32 %v4260_v30, %v2139_v9 }
 0x6e2   : > { %v2161_v13 = vadd.f32 %v4260_v30, %v2138_v11 }
 0x6e3   : > { %2178 = vst [vmem:[%s3891_s29 + $0x48] sm:$0xff] %v2162_v12 }
 0x6e4   : > { %2177 = vst [vmem:[%s3891_s29 + $0x40] sm:$0xff] %v2161_v13 }
 0x6e6   : > { %v2925_v16 = vpop.f32.mrb[10].mxu1 }
 0x6e7   : > { %v2141_v17 = vadd.f32 %v2925_v16, %v2125_v14  ;;  %v2084_v44 = vpop.f32.mrb[11].mxu1 }
 0x6e8   : > { %v2140_v45 = vadd.f32 %v2124_v15, %v2084_v44 }
 0x6e9   : > { %v2164_v46 = vadd.f32 %v4260_v30, %v2141_v17 }
 0x6ea   : > { %v2163_v47 = vadd.f32 %v4260_v30, %v2140_v45 }
 0x6eb   : > { %2180 = vst [vmem:[%s3891_s29 + $0x58] sm:$0xff] %v2164_v46 }
 0x6ec   : > { %2179 = vst [vmem:[%s3891_s29 + $0x50] sm:$0xff] %v2163_v47 }
 0x6ee   : > { %v2928_v31 = vpop.f32.mrb[12].mxu1 }
 0x6ef   : > { %v2143_v18 = vadd.f32 %v2928_v31, %v2127_v54  ;;  %v2094_v19 = vpop.f32.mrb[13].mxu1 }
 0x6f0   : > { %v2142_v21 = vadd.f32 %v2126_v20, %v2094_v19 }
 0x6f1   : > { %v2166_v33 = vadd.f32 %v4260_v30, %v2143_v18 }
 0x6f2   : > { %v2165_v62 = vadd.f32 %v4260_v30, %v2142_v21 }
 0x6f3   : > { %2182 = vst [vmem:[%s3891_s29 + $0x68] sm:$0xff] %v2166_v33 }
 0x6f4   : > { %2181 = vst [vmem:[%s3891_s29 + $0x60] sm:$0xff] %v2165_v62 }
 0x6f6   : > { %v2931_v50 = vpop.f32.mrb[14].mxu1 }
 0x6f7   : > { %v2145_v61 = vadd.f32 %v2931_v50, %v2129_v35  ;;  %v2104_v53 = vpop.f32.mrb[15].mxu1 }
 0x6f8   : > { %v2144_v63 = vadd.f32 %v2128_v28, %v2104_v53 }
 0x6f9   : > { %v2168_v36 = vadd.f32 %v4260_v30, %v2145_v61 }
 0x6fa   : > { %v2167_v37 = vadd.f32 %v4260_v30, %v2144_v63 }
 0x6fb   : > { %2184 = vst [vmem:[%s3891_s29 + $0x78] sm:$0xff] %v2168_v36 }
 0x6fc   : > { %2183 = vst [vmem:[%s3891_s29 + $0x70] sm:$0xff] %v2167_v37 }
 0x6fd PF: > { %s4466_s18 = sld [smem:[#allocation24_spill]]  ;;  %s2381_s28 = sshll.u32 %s3471_s16, 11 }
 0x6fe   : > { %s4467_s30 = sld [smem:[#allocation43_spill]]  ;;  %s2199_s20 = sshll.u32 %s3891_s29, 4  ;;  %s4315_s20 = int_to_ptr.vmem [resolvable:$true] %s2199_s20 }
 0x6ff   : > { %s4319_s19 = scalar_lea.sflag [#allocation7], %s440_s25  ;;  %s3381_s21 = scalar_lea.vmem %s4315_s20, 2048 }
 0x700   : > { %p3382_p1 = scmp.ne.s32.totalorder %s4315_s20, %s3381_s21  ;;  %s3498_s16 = smov [#allocation13]  }
 0x701   : > { %s3385_s23 = sshll.u32 %s3498_s16, 4  ;;  %s3386_s23 = int_to_ptr.vmem [resolvable:$false] %s3385_s23 }
 0x702   : > { %s3387_s15 = scalar_lea.vmem %s3386_s23, 4096  ;;  %p3388_p7 = scmp.lt.s32.totalorder %s4315_s20, %s3386_s23 }
 0x703   : > { %p4468_p4 = scmp.ne.s32.totalorder %s4466_s18, 0  ;;  %p3389_p9 = scmp.lt.s32.totalorder %s3387_s15, %s3381_s21 }
 0x704   : > { %s4312_s13 = scalar_lea.hbm %s4467_s30, %s2381_s28 }
 0x705   : > { %p3383_p5 = pnand %p3382_p1, %p4468_p4  ;;  %p3390_p10 = por %p3389_p9, %p3388_p7 }
 0x707   : > { %p3384_p6 = pneg %p3383_p5 }
 0x709   : > { %p3391_p13 = pnand %p3390_p10, %p3384_p6 }
 0x70b   : > { %3394 = shalt.err (!%p3391_p13)
}
 0x70c   : > { %s3395_s25 = scalar_lea.hbm %s4312_s13, 2048  ;;  %s3399_s22 = scalar_lea.hbm %s4467_s30, 4096 }
 0x70d   : > { %p3396_p3 = scmp.ne.s32.totalorder %s4312_s13, %s3395_s25  ;;  %p3400_p8 = scmp.lt.u32.totalorder %s4312_s13, %s4467_s30 }
 0x70e   : > { %p3401_p11 = scmp.lt.u32.totalorder %s3399_s22, %s3395_s25  ;;  %p3403_p1 = scmp.lt.u32.totalorder %s3395_s25, %s4312_s13 }
 0x70f   : > { %p3397_p2 = pnand %p3396_p3, %p4468_p4 }
 0x710   : > { %p3402_p12 = por %p3401_p11, %p3400_p8 }
 0x711   : > { %p3398_p0 = pneg %p3397_p2 }
 0x712   : > { %p3404_p5 = por %p3403_p1, %p3402_p12 }
 0x714   : > { %p3405_p6 = pnand %p3404_p5, %p3398_p0 }
 0x716   : > { %3408 = shalt.err (!%p3405_p6)
}
 0x717   : > { %s3499_s17 = smov 128   ;;  %s3500_s12 = smov 8  }
 0x718   : > { %3160 = dma.vmem_to_hbm [thread:$0]  (%p4468_p4), %s4315_s20, 2048, %s4312_s13, %s4319_s19, %s3499_s17, %s3499_s17, %s3500_s12  }
 0x719 PF: > { %s4469_s24 = sld [smem:[#allocation22_spill]]  ;;  %s4470_s28 = sld [smem:[#allocation18_spill]] }
 0x71a   : > { %s4471_s4 = sld [smem:[#allocation27_spill]] }
 0x71f   : > { %p3187_p7 = scmp.ge.s32.totalorder %s4469_s24, 2  ;;  %s2214_s27 = sand.u32 1, %s4470_s28  }
 0x720   : > { %p4472_p9 = scmp.ne.s32.totalorder %s4471_s4, 0  ;;  %s2215_s21 = scalar_lea.sflag [#allocation7], %s2214_s27 }
 0x722   : > { %p3176_p10 = pnand %p3187_p7, %p4472_p9 }
 0x724   : > { %3454 = dma.done.wait (!%p3176_p10), %s2215_s21, 2048  }
 0x725   : > { %3456 = vsyncadd (!%p3176_p10), %s2215_s21, 4294965248  ;;  %s26_s20 = sadd.s32 1, %s4469_s24   ;;  %s4473_s16 = sld [smem:[#allocation19_spill]] }
 0x726   : > { %p23_p13 = scmp.ge.s32.totalorder %s26_s20, 8   ;;  %s4474_s15 = sld [smem:[#allocation26_spill]] }
 0x727   : > { %s4475_s23 = sld [smem:[#allocation20_spill]]  ;;  %s4476_s17 = sld [smem:[#allocation21_spill]] }
 0x728   : > { %s4477_s18 = sld [smem:[#allocation23_spill]]  ;;  %s4478_s19 = sld [smem:[#allocation25_spill]] }
 0x729   : > { %s4479_s13 = smov %s3463_s14  ;;  %25 = sbr.rel (!%p23_p13) target bundleno = 11 (0xb), region = 131 }
 0x72b   : > { %s4480_s14 = smov %s4473_s16 }
 0x72d   : > { %s4481_s16 = smov %s4475_s23 }
 0x730   :  { %2220 = vsyncpa [#allocation6], 1 }
 0x731   :  { %2222 = vsyncpa [#allocation6 + $0x1], 1 }
 0x732   :  { %2223 = vsyncpa [#allocation9], 1 }
 0x733   :  { %2224 = vsyncpa [#allocation12], 1 }
 0x734   :  { %2225 = vsyncpa [#allocation7], 1 }
 0x735   :  { %2227 = vsyncpa [#allocation7 + $0x1], 1 }

</bundles_post_ra>
